<compile_context>
chip_gen: v6e
topology: v6e:2x2x1
jax: 0.10.0
libtpu: 0.0.40
codegen_flags: <defaults>
</compile_context>

<pallas_src>
import functools

import jax
import jax.numpy as jnp
import numpy as np
from jax.experimental import pallas as pl
from jax.experimental.pallas import tpu as pltpu


# --------------------------------------------------------------------------- #
# Pallas kernel: whole forward pass (2-layer GRU + FC head) in one call.      #
# --------------------------------------------------------------------------- #
def confidence_gru_kernel(x_ref, w_ref, v_ref, out_ref, *, T, B, Bp, H, I):
    # x_ref : (T*Bp, I)      time-major x, batch padded to Bp rows per step
    # w_ref : (I+3H, 6H)     [wih0 ; [[whh0, wih1],[whh1, 0]] ; fc1w] (lane-padded)
    # v_ref : (2Bp+8, 3H)    [bhh_n stack ; b0 ; b1 ; fc1b ; fc2w ; fc2b ; pad]
    # out   : (B, 1)
    H2, H3, Hh = 2 * H, 3 * H, H // 2
    f32 = jnp.float32

    # ---- weight slab (static slices of the VMEM ref) -------------------------
    wih0 = w_ref[0:I, 0:H3]                      # (I, 3H)  layer-0 input projection
    wbig = w_ref[I:I + H2, :]                    # (2H, 6H) [[whh0, wih1],[whh1, 0]]
    fc1w = w_ref[I + H2:I + H3, 0:Hh]            # (H, Hh)

    # ---- bias / vector slab ---------------------------------------------------
    v = v_ref[...]
    bhn_stack = v[0:2 * Bp, 0:H]                 # rows <Bp: bhh_n layer0, >=Bp: layer1
    b0 = v[2 * Bp + 0:2 * Bp + 1, :]             # (1,3H) bih0 + [bhh0_r, bhh0_z, 0]
    b1 = v[2 * Bp + 1:2 * Bp + 2, :]             # (1,3H) same for layer 1
    fc1b = v[2 * Bp + 2:2 * Bp + 3, 0:Hh]        # (1,Hh)
    fc2w = v[2 * Bp + 3:2 * Bp + 4, 0:Hh]        # (1,Hh) fc2 weight row
    fc2b = v[2 * Bp + 4:2 * Bp + 5, 0:1]         # (1,1)

    # ---- layer-0 input projection hoisted out of the recurrence (one dot) ----
    xw0 = jnp.dot(x_ref[...], wih0, preferred_element_type=f32) + b0   # (T*Bp, 3H)

    # Block-diagonal mask, built once and reused by the unrolled loop.
    r_idx = jax.lax.broadcasted_iota(jnp.int32, (2 * Bp, H2), 0)
    c_idx = jax.lax.broadcasted_iota(jnp.int32, (2 * Bp, H2), 1)
    diag_mask = jnp.where(((r_idx < Bp) & (c_idx < H)) |
                          ((r_idx >= Bp) & (c_idx >= H)), 1.0, 0.0).astype(f32)

    def gru_gates(h_prev, g_in, hw, bhh_n):
        # g_in already holds x@Wih + (bih_r+bhh_r, bih_z+bhh_z, bih_n)
        rz = jax.nn.sigmoid(g_in[:, :H2] + hw[:, :H2])        # one EUP slab (r,z)
        r = rz[:, :H]
        z = rz[:, H:]
        n = jnp.tanh(g_in[:, H2:] + r * (hw[:, H2:] + bhh_n))
        return n + z * (h_prev - n)                            # == (1-z)*n + z*h

    def fused_hidden_dot(h0_, h1_):
        hstack = jnp.concatenate([h0_, h1_], axis=0)                   # (2Bp, H)
        hbd = jnp.concatenate([hstack, hstack], axis=1) * diag_mask    # (2Bp, 2H)
        g = jnp.dot(hbd, wbig, preferred_element_type=f32)             # (2Bp, 6H)
        return hstack, g

    zeros_h = jnp.zeros((Bp, H), f32)
    zeros_hw = jnp.zeros((Bp, H3), f32)

    # Prologue: layer-0 step 0 (h0_{-1}=0 -> hidden projection is zero, no dot).
    h0 = gru_gates(zeros_h, xw0[0:Bp, :], zeros_hw, bhn_stack[0:Bp, :])
    h1 = zeros_h

    # Software-pipelined recurrence: one fused dot per step on the serial path.
    for i in range(1, T):                      # T is static -> fully unrolled
        hstack, g = fused_hidden_dot(h0, h1)   # h0 = h0_{i-1}, h1 = h1_{i-2}
        xw1 = g[0:Bp, H3:] + b1                # layer-1 input proj of h0_{i-1}
        gin = jnp.concatenate([xw0[i * Bp:(i + 1) * Bp, :], xw1], axis=0)
        hnew = gru_gates(hstack, gin, g[:, 0:H3], bhn_stack)   # both layers at once
        h0 = hnew[0:Bp, :]                     # h0_i
        h1 = hnew[Bp:, :]                      # h1_{i-1}

    # Epilogue: final layer-1 step T-1 (layer 0 already finished).
    _, g = fused_hidden_dot(h0, h1)
    xw1 = g[0:Bp, H3:] + b1
    h1 = gru_gates(h1, xw1, g[Bp:, 0:H3], bhn_stack[Bp:, :])   # == gru_out[:, -1, :]

    # ---- fc head: Linear -> ReLU -> (Dropout=identity) -> Linear -> Sigmoid --
    z1 = jnp.maximum(jnp.dot(h1, fc1w, preferred_element_type=f32) + fc1b, 0.0)
    # fc2 (out_features=1): VPU multiply + lane reduce instead of an MXU dot.
    logits = jnp.sum(z1 * fc2w, axis=-1, keepdims=True) + fc2b            # (Bp, 1)
    out_ref[...] = jax.nn.sigmoid(logits)[0:B, :]


# --------------------------------------------------------------------------- #
# Host-side packing of PyTorch-layout params into the two kernel slabs.       #
# --------------------------------------------------------------------------- #
def _round_up(n, m):
    return ((n + m - 1) // m) * m


def pack_params(params, input_size, hidden_size, batch_pad):
    H, I, Bp = hidden_size, input_size, batch_pad
    H2, H3, H6, Hh = 2 * H, 3 * H, 6 * H, H // 2
    f32 = jnp.float32

    wih0 = params["wih0"].T          # (I, 3H)   gate order (r, z, n)
    whh0 = params["whh0"].T          # (H, 3H)
    wih1 = params["wih1"].T          # (H, 3H)
    whh1 = params["whh1"].T          # (H, 3H)
    fc1w = params["fc1w"].T          # (H, Hh)

    # Weight slab: (I + 3H, 6H)
    w_slab = jnp.concatenate([
        jnp.pad(wih0, ((0, 0), (0, H6 - H3))),
        jnp.concatenate([whh0, wih1], axis=1),                       # top block row
        jnp.concatenate([whh1, jnp.zeros((H, H3), f32)], axis=1),    # bottom block row
        jnp.pad(fc1w, ((0, 0), (0, H6 - Hh))),
    ], axis=0)

    def fold(bih, bhh):   # fold bhh_r, bhh_z into the input-side bias (bhh_n stays out)
        return jnp.concatenate([bih[:H2] + bhh[:H2], bih[H2:]])

    def row(vec):         # one (1, 3H) zero-padded row
        return jnp.pad(vec, (0, H3 - vec.shape[0]))[None, :]

    # Vector slab: (2*Bp + 8, 3H)
    v_slab = jnp.concatenate([
        jnp.tile(row(params["bhh0"][H2:]), (Bp, 1)),    # bhh_n layer 0 (rows 0..Bp-1)
        jnp.tile(row(params["bhh1"][H2:]), (Bp, 1)),    # bhh_n layer 1 (rows Bp..2Bp-1)
        row(fold(params["bih0"], params["bhh0"])),      # b0
        row(fold(params["bih1"], params["bhh1"])),      # b1
        row(params["fc1b"]),
        row(params["fc2w"][0]),
        row(params["fc2b"]),
        jnp.zeros((3, H3), f32),                        # pad rows to a multiple of 8
    ], axis=0)
    return w_slab, v_slab


def confidence_gru_forward(x, params):
    """x: (B, T, input_size) float32 -> (B, 1) float32 (ConfidenceGRU.forward, eval)."""
    B, T, I = x.shape
    H = params["whh0"].shape[-1]
    Bp = max(8, _round_up(B, 8))

    # Pack x into padded time-major layout.  Done here (inside the jitted
    # wrapper) so the transpose/pad/reshape fuses with the rest of the packing
    # instead of being a standalone copy kernel before the pallas_call.
    x_tm = jnp.transpose(x, (1, 0, 2))                  # (T, B, I)
    x_tm = jnp.pad(x_tm, ((0, 0), (0, Bp - B), (0, 0))) # (T, Bp, I)
    x_flat = x_tm.reshape(T * Bp, I).astype(jnp.float32)

    w_slab, v_slab = pack_params(params, I, H, Bp)

    kernel = functools.partial(confidence_gru_kernel, T=T, B=B, Bp=Bp, H=H, I=I)
    # NOTE: if batch is scaled up, add a batch grid axis with
    # dimension_semantics=("parallel",) (2 TCs on v7x); not worth it at B=2.
    return pl.pallas_call(
        kernel,
        out_shape=jax.ShapeDtypeStruct((B, 1), jnp.float32),
        in_specs=[pl.BlockSpec(memory_space=pltpu.MemorySpace.VMEM)] * 3,
        out_specs=pl.BlockSpec(memory_space=pltpu.MemorySpace.VMEM),
    )(x_flat, w_slab, v_slab)


# --------------------------------------------------------------------------- #
# Deterministic parameter init in native PyTorch layout.                      #
# --------------------------------------------------------------------------- #
def init_params(key, input_size, hidden_size):
    H = hidden_size
    Hh = H // 2
    k_gru = 1.0 / np.sqrt(H)

    def unif(key, shape, k):
        return jax.random.uniform(key, shape, jnp.float32, minval=-k, maxval=k)

    keys = jax.random.split(key, 12)
    return {
        "wih0": unif(keys[0], (3 * H, input_size), k_gru),
        "whh0": unif(keys[1], (3 * H, H), k_gru),
        "bih0": unif(keys[2], (3 * H,), k_gru),
        "bhh0": unif(keys[3], (3 * H,), k_gru),
        "wih1": unif(keys[4], (3 * H, H), k_gru),
        "whh1": unif(keys[5], (3 * H, H), k_gru),
        "bih1": unif(keys[6], (3 * H,), k_gru),
        "bhh1": unif(keys[7], (3 * H,), k_gru),
        "fc1w": unif(keys[8], (Hh, H), 1.0 / np.sqrt(H)),
        "fc1b": unif(keys[9], (Hh,), 1.0 / np.sqrt(H)),
        "fc2w": unif(keys[10], (1, Hh), 1.0 / np.sqrt(Hh)),
        "fc2b": unif(keys[11], (1,), 1.0 / np.sqrt(Hh)),
    }


# --------------------------------------------------------------------------- #
# Pure-JAX reference (mirrors torch.nn.GRU + fc head, eval mode; unfused).    #
# --------------------------------------------------------------------------- #
def reference_forward(x, params):
    B, T, I = x.shape
    H = params["whh0"].shape[-1]

    def cell(x_t, h_prev, wih, whh, bih, bhh):
        gi = x_t @ wih.T + bih
        gh = h_prev @ whh.T + bhh
        i_r, i_z, i_n = gi[:, :H], gi[:, H:2 * H], gi[:, 2 * H:]
        h_r, h_z, h_n = gh[:, :H], gh[:, H:2 * H], gh[:, 2 * H:]
        r = jax.nn.sigmoid(i_r + h_r)
        z = jax.nn.sigmoid(i_z + h_z)
        n = jnp.tanh(i_n + r * h_n)
        return (1.0 - z) * n + z * h_prev

    h0 = jnp.zeros((B, H), jnp.float32)
    h1 = jnp.zeros((B, H), jnp.float32)
    for t in range(T):
        x_t = x[:, t, :]
        h0 = cell(x_t, h0, params["wih0"], params["whh0"], params["bih0"], params["bhh0"])
        h1 = cell(h0, h1, params["wih1"], params["whh1"], params["bih1"], params["bhh1"])

    z1 = jnp.maximum(h1 @ params["fc1w"].T + params["fc1b"], 0.0)
    return jax.nn.sigmoid(z1 @ params["fc2w"].T + params["fc2b"])


if __name__ == "__main__":
    B, T, INPUT_SIZE, HIDDEN_SIZE = 2, 8, 8, 32

    key = jax.random.PRNGKey(0)
    kx, kp = jax.random.split(key)
    x = jax.random.normal(kx, (B, T, INPUT_SIZE), jnp.float32)
    params = init_params(kp, INPUT_SIZE, HIDDEN_SIZE)

    fwd = jax.jit(confidence_gru_forward)
    out = jax.block_until_ready(fwd(x, params))

    ref = reference_forward(x, params)
    np.testing.assert_allclose(np.asarray(out), np.asarray(ref), rtol=1e-5, atol=1e-5)
    assert out.shape == (B, 1)

    print("KERNEL_OK")
</pallas_src>

<mosaic_0001>
module attributes {stable_mosaic.version = 11 : i64} {
  func.func @confidence_gru_kernel(%arg0: memref<64x8xf32, #tpu.memory_space<vmem>>, %arg1: memref<104x192xf32, #tpu.memory_space<vmem>>, %arg2: memref<24x96xf32, #tpu.memory_space<vmem>>, %arg3: memref<2x1xf32, #tpu.memory_space<vmem>>) attributes {dimension_semantics = [], scalar_prefetch = 0 : i64, scratch_operands = 0 : i64, tpu.core_type = #tpu.core_type<tc>} {
    %c0 = arith.constant 0 : index
    %c0_0 = arith.constant 0 : index
    %0 = vector.load %arg1[%c0, %c0_0] : memref<104x192xf32, #tpu.memory_space<vmem>>, vector<8x96xf32>
    %c8 = arith.constant 8 : index
    %c0_1 = arith.constant 0 : index
    %1 = vector.load %arg1[%c8, %c0_1] : memref<104x192xf32, #tpu.memory_space<vmem>>, vector<64x192xf32>
    %c72 = arith.constant 72 : index
    %c0_2 = arith.constant 0 : index
    %2 = vector.load %arg1[%c72, %c0_2] : memref<104x192xf32, #tpu.memory_space<vmem>>, vector<32x16xf32>
    %c0_3 = arith.constant 0 : index
    %c0_4 = arith.constant 0 : index
    %3 = vector.load %arg2[%c0_3, %c0_4] : memref<24x96xf32, #tpu.memory_space<vmem>>, vector<24x96xf32>
    %4 = vector.extract_strided_slice %3 {offsets = [0, 0], sizes = [16, 32], strides = [1, 1]} : vector<24x96xf32> to vector<16x32xf32>
    %5 = vector.extract_strided_slice %3 {offsets = [16, 0], sizes = [1, 96], strides = [1, 1]} : vector<24x96xf32> to vector<1x96xf32>
    %6 = vector.extract_strided_slice %3 {offsets = [17, 0], sizes = [1, 96], strides = [1, 1]} : vector<24x96xf32> to vector<1x96xf32>
    %7 = vector.extract_strided_slice %3 {offsets = [18, 0], sizes = [1, 16], strides = [1, 1]} : vector<24x96xf32> to vector<1x16xf32>
    %8 = vector.extract_strided_slice %3 {offsets = [19, 0], sizes = [1, 16], strides = [1, 1]} : vector<24x96xf32> to vector<1x16xf32>
    %9 = vector.extract_strided_slice %3 {offsets = [20, 0], sizes = [1, 1], strides = [1, 1]} : vector<24x96xf32> to vector<1x1xf32>
    %c0_5 = arith.constant 0 : index
    %c0_6 = arith.constant 0 : index
    %10 = vector.load %arg0[%c0_5, %c0_6] : memref<64x8xf32, #tpu.memory_space<vmem>>, vector<64x8xf32>
    %cst = arith.constant dense<0.000000e+00> : vector<64x96xf32>
    %11 = tpu.matmul %10, %0, %cst {dimension_numbers = #tpu.dot_dimension_numbers<[1], [0], [0], [1], [0, 0, 1, 1], [], []>} : vector<64x8xf32>, vector<8x96xf32>, vector<64x96xf32> -> vector<64x96xf32>
    %12 = vector.broadcast %5 : vector<1x96xf32> to vector<64x96xf32>
    %13 = arith.addf %11, %12 : vector<64x96xf32>
    %14 = tpu.iota {dimensions = array<i32: 0>} : vector<16x64xi32>
    %15 = tpu.iota {dimensions = array<i32: 1>} : vector<16x64xi32>
    %c8_i32 = arith.constant 8 : i32
    %16 = vector.broadcast %c8_i32 : i32 to vector<16x64xi32>
    %17 = arith.cmpi slt, %14, %16 : vector<16x64xi32>
    %c32_i32 = arith.constant 32 : i32
    %18 = vector.broadcast %c32_i32 : i32 to vector<16x64xi32>
    %19 = arith.cmpi slt, %15, %18 : vector<16x64xi32>
    %20 = arith.andi %17, %19 : vector<16x64xi1>
    %c8_i32_7 = arith.constant 8 : i32
    %21 = vector.broadcast %c8_i32_7 : i32 to vector<16x64xi32>
    %22 = arith.cmpi sge, %14, %21 : vector<16x64xi32>
    %c32_i32_8 = arith.constant 32 : i32
    %23 = vector.broadcast %c32_i32_8 : i32 to vector<16x64xi32>
    %24 = arith.cmpi sge, %15, %23 : vector<16x64xi32>
    %25 = arith.andi %22, %24 : vector<16x64xi1>
    %26 = arith.ori %20, %25 : vector<16x64xi1>
    %cst_9 = arith.constant 1.000000e+00 : f32
    %cst_10 = arith.constant 0.000000e+00 : f32
    %27 = vector.broadcast %cst_9 : f32 to vector<16x64xf32>
    %28 = vector.broadcast %cst_10 : f32 to vector<16x64xf32>
    %29 = arith.select %26, %27, %28 : vector<16x64xi1>, vector<16x64xf32>
    %cst_11 = arith.constant 0.000000e+00 : f32
    %30 = vector.broadcast %cst_11 : f32 to vector<8x32xf32>
    %cst_12 = arith.constant 0.000000e+00 : f32
    %31 = vector.broadcast %cst_12 : f32 to vector<8x96xf32>
    %32 = vector.extract_strided_slice %13 {offsets = [0, 0], sizes = [8, 96], strides = [1, 1]} : vector<64x96xf32> to vector<8x96xf32>
    %33 = vector.extract_strided_slice %4 {offsets = [0, 0], sizes = [8, 32], strides = [1, 1]} : vector<16x32xf32> to vector<8x32xf32>
    %34 = vector.extract_strided_slice %32 {offsets = [0, 0], sizes = [8, 64], strides = [1, 1]} : vector<8x96xf32> to vector<8x64xf32>
    %35 = vector.extract_strided_slice %31 {offsets = [0, 0], sizes = [8, 64], strides = [1, 1]} : vector<8x96xf32> to vector<8x64xf32>
    %36 = arith.addf %34, %35 : vector<8x64xf32>
    %37 = arith.negf %36 : vector<8x64xf32>
    %38 = math.exp %37 : vector<8x64xf32>
    %cst_13 = arith.constant 1.000000e+00 : f32
    %39 = vector.broadcast %cst_13 : f32 to vector<8x64xf32>
    %40 = arith.addf %39, %38 : vector<8x64xf32>
    %41 = arith.divf %39, %40 : vector<8x64xf32>
    %42 = vector.extract_strided_slice %41 {offsets = [0, 0], sizes = [8, 32], strides = [1, 1]} : vector<8x64xf32> to vector<8x32xf32>
    %43 = vector.extract_strided_slice %41 {offsets = [0, 32], sizes = [8, 32], strides = [1, 1]} : vector<8x64xf32> to vector<8x32xf32>
    %44 = vector.extract_strided_slice %32 {offsets = [0, 64], sizes = [8, 32], strides = [1, 1]} : vector<8x96xf32> to vector<8x32xf32>
    %45 = vector.extract_strided_slice %31 {offsets = [0, 64], sizes = [8, 32], strides = [1, 1]} : vector<8x96xf32> to vector<8x32xf32>
    %46 = arith.addf %45, %33 : vector<8x32xf32>
    %47 = arith.mulf %42, %46 : vector<8x32xf32>
    %48 = arith.addf %44, %47 : vector<8x32xf32>
    %49 = math.tanh %48 : vector<8x32xf32>
    %50 = arith.subf %30, %49 : vector<8x32xf32>
    %51 = arith.mulf %43, %50 : vector<8x32xf32>
    %52 = arith.addf %49, %51 : vector<8x32xf32>
    %53 = tpu.concatenate %52, %30 in 0 : vector<8x32xf32>, vector<8x32xf32> -> vector<16x32xf32>
    %54 = tpu.concatenate %53, %53 in 1 : vector<16x32xf32>, vector<16x32xf32> -> vector<16x64xf32>
    %55 = arith.mulf %54, %29 : vector<16x64xf32>
    %cst_14 = arith.constant dense<0.000000e+00> : vector<16x192xf32>
    %56 = tpu.matmul %55, %1, %cst_14 {dimension_numbers = #tpu.dot_dimension_numbers<[1], [0], [0], [1], [0, 0, 1, 1], [], []>} : vector<16x64xf32>, vector<64x192xf32>, vector<16x192xf32> -> vector<16x192xf32>
    %57 = vector.extract_strided_slice %56 {offsets = [0, 96], sizes = [8, 96], strides = [1, 1]} : vector<16x192xf32> to vector<8x96xf32>
    %58 = vector.broadcast %6 : vector<1x96xf32> to vector<8x96xf32>
    %59 = arith.addf %57, %58 : vector<8x96xf32>
    %60 = vector.extract_strided_slice %13 {offsets = [8, 0], sizes = [8, 96], strides = [1, 1]} : vector<64x96xf32> to vector<8x96xf32>
    %61 = tpu.concatenate %60, %59 in 0 : vector<8x96xf32>, vector<8x96xf32> -> vector<16x96xf32>
    %62 = vector.extract_strided_slice %56 {offsets = [0, 0], sizes = [16, 96], strides = [1, 1]} : vector<16x192xf32> to vector<16x96xf32>
    %63 = vector.extract_strided_slice %61 {offsets = [0, 0], sizes = [16, 64], strides = [1, 1]} : vector<16x96xf32> to vector<16x64xf32>
    %64 = vector.extract_strided_slice %62 {offsets = [0, 0], sizes = [16, 64], strides = [1, 1]} : vector<16x96xf32> to vector<16x64xf32>
    %65 = arith.addf %63, %64 : vector<16x64xf32>
    %66 = arith.negf %65 : vector<16x64xf32>
    %67 = math.exp %66 : vector<16x64xf32>
    %cst_15 = arith.constant 1.000000e+00 : f32
    %68 = vector.broadcast %cst_15 : f32 to vector<16x64xf32>
    %69 = arith.addf %68, %67 : vector<16x64xf32>
    %70 = arith.divf %68, %69 : vector<16x64xf32>
    %71 = vector.extract_strided_slice %70 {offsets = [0, 0], sizes = [16, 32], strides = [1, 1]} : vector<16x64xf32> to vector<16x32xf32>
    %72 = vector.extract_strided_slice %70 {offsets = [0, 32], sizes = [16, 32], strides = [1, 1]} : vector<16x64xf32> to vector<16x32xf32>
    %73 = vector.extract_strided_slice %61 {offsets = [0, 64], sizes = [16, 32], strides = [1, 1]} : vector<16x96xf32> to vector<16x32xf32>
    %74 = vector.extract_strided_slice %62 {offsets = [0, 64], sizes = [16, 32], strides = [1, 1]} : vector<16x96xf32> to vector<16x32xf32>
    %75 = arith.addf %74, %4 : vector<16x32xf32>
    %76 = arith.mulf %71, %75 : vector<16x32xf32>
    %77 = arith.addf %73, %76 : vector<16x32xf32>
    %78 = math.tanh %77 : vector<16x32xf32>
    %79 = arith.subf %53, %78 : vector<16x32xf32>
    %80 = arith.mulf %72, %79 : vector<16x32xf32>
    %81 = arith.addf %78, %80 : vector<16x32xf32>
    %82 = vector.extract_strided_slice %81 {offsets = [0, 0], sizes = [8, 32], strides = [1, 1]} : vector<16x32xf32> to vector<8x32xf32>
    %83 = vector.extract_strided_slice %81 {offsets = [8, 0], sizes = [8, 32], strides = [1, 1]} : vector<16x32xf32> to vector<8x32xf32>
    %84 = tpu.concatenate %82, %83 in 0 : vector<8x32xf32>, vector<8x32xf32> -> vector<16x32xf32>
    %85 = tpu.concatenate %84, %84 in 1 : vector<16x32xf32>, vector<16x32xf32> -> vector<16x64xf32>
    %86 = arith.mulf %85, %29 : vector<16x64xf32>
    %cst_16 = arith.constant dense<0.000000e+00> : vector<16x192xf32>
    %87 = tpu.matmul %86, %1, %cst_16 {dimension_numbers = #tpu.dot_dimension_numbers<[1], [0], [0], [1], [0, 0, 1, 1], [], []>} : vector<16x64xf32>, vector<64x192xf32>, vector<16x192xf32> -> vector<16x192xf32>
    %88 = vector.extract_strided_slice %87 {offsets = [0, 96], sizes = [8, 96], strides = [1, 1]} : vector<16x192xf32> to vector<8x96xf32>
    %89 = vector.broadcast %6 : vector<1x96xf32> to vector<8x96xf32>
    %90 = arith.addf %88, %89 : vector<8x96xf32>
    %91 = vector.extract_strided_slice %13 {offsets = [16, 0], sizes = [8, 96], strides = [1, 1]} : vector<64x96xf32> to vector<8x96xf32>
    %92 = tpu.concatenate %91, %90 in 0 : vector<8x96xf32>, vector<8x96xf32> -> vector<16x96xf32>
    %93 = vector.extract_strided_slice %87 {offsets = [0, 0], sizes = [16, 96], strides = [1, 1]} : vector<16x192xf32> to vector<16x96xf32>
    %94 = vector.extract_strided_slice %92 {offsets = [0, 0], sizes = [16, 64], strides = [1, 1]} : vector<16x96xf32> to vector<16x64xf32>
    %95 = vector.extract_strided_slice %93 {offsets = [0, 0], sizes = [16, 64], strides = [1, 1]} : vector<16x96xf32> to vector<16x64xf32>
    %96 = arith.addf %94, %95 : vector<16x64xf32>
    %97 = arith.negf %96 : vector<16x64xf32>
    %98 = math.exp %97 : vector<16x64xf32>
    %cst_17 = arith.constant 1.000000e+00 : f32
    %99 = vector.broadcast %cst_17 : f32 to vector<16x64xf32>
    %100 = arith.addf %99, %98 : vector<16x64xf32>
    %101 = arith.divf %99, %100 : vector<16x64xf32>
    %102 = vector.extract_strided_slice %101 {offsets = [0, 0], sizes = [16, 32], strides = [1, 1]} : vector<16x64xf32> to vector<16x32xf32>
    %103 = vector.extract_strided_slice %101 {offsets = [0, 32], sizes = [16, 32], strides = [1, 1]} : vector<16x64xf32> to vector<16x32xf32>
    %104 = vector.extract_strided_slice %92 {offsets = [0, 64], sizes = [16, 32], strides = [1, 1]} : vector<16x96xf32> to vector<16x32xf32>
    %105 = vector.extract_strided_slice %93 {offsets = [0, 64], sizes = [16, 32], strides = [1, 1]} : vector<16x96xf32> to vector<16x32xf32>
    %106 = arith.addf %105, %4 : vector<16x32xf32>
    %107 = arith.mulf %102, %106 : vector<16x32xf32>
    %108 = arith.addf %104, %107 : vector<16x32xf32>
    %109 = math.tanh %108 : vector<16x32xf32>
    %110 = arith.subf %84, %109 : vector<16x32xf32>
    %111 = arith.mulf %103, %110 : vector<16x32xf32>
    %112 = arith.addf %109, %111 : vector<16x32xf32>
    %113 = vector.extract_strided_slice %112 {offsets = [0, 0], sizes = [8, 32], strides = [1, 1]} : vector<16x32xf32> to vector<8x32xf32>
    %114 = vector.extract_strided_slice %112 {offsets = [8, 0], sizes = [8, 32], strides = [1, 1]} : vector<16x32xf32> to vector<8x32xf32>
    %115 = tpu.concatenate %113, %114 in 0 : vector<8x32xf32>, vector<8x32xf32> -> vector<16x32xf32>
    %116 = tpu.concatenate %115, %115 in 1 : vector<16x32xf32>, vector<16x32xf32> -> vector<16x64xf32>
    %117 = arith.mulf %116, %29 : vector<16x64xf32>
    %cst_18 = arith.constant dense<0.000000e+00> : vector<16x192xf32>
    %118 = tpu.matmul %117, %1, %cst_18 {dimension_numbers = #tpu.dot_dimension_numbers<[1], [0], [0], [1], [0, 0, 1, 1], [], []>} : vector<16x64xf32>, vector<64x192xf32>, vector<16x192xf32> -> vector<16x192xf32>
    %119 = vector.extract_strided_slice %118 {offsets = [0, 96], sizes = [8, 96], strides = [1, 1]} : vector<16x192xf32> to vector<8x96xf32>
    %120 = vector.broadcast %6 : vector<1x96xf32> to vector<8x96xf32>
    %121 = arith.addf %119, %120 : vector<8x96xf32>
    %122 = vector.extract_strided_slice %13 {offsets = [24, 0], sizes = [8, 96], strides = [1, 1]} : vector<64x96xf32> to vector<8x96xf32>
    %123 = tpu.concatenate %122, %121 in 0 : vector<8x96xf32>, vector<8x96xf32> -> vector<16x96xf32>
    %124 = vector.extract_strided_slice %118 {offsets = [0, 0], sizes = [16, 96], strides = [1, 1]} : vector<16x192xf32> to vector<16x96xf32>
    %125 = vector.extract_strided_slice %123 {offsets = [0, 0], sizes = [16, 64], strides = [1, 1]} : vector<16x96xf32> to vector<16x64xf32>
    %126 = vector.extract_strided_slice %124 {offsets = [0, 0], sizes = [16, 64], strides = [1, 1]} : vector<16x96xf32> to vector<16x64xf32>
    %127 = arith.addf %125, %126 : vector<16x64xf32>
    %128 = arith.negf %127 : vector<16x64xf32>
    %129 = math.exp %128 : vector<16x64xf32>
    %cst_19 = arith.constant 1.000000e+00 : f32
    %130 = vector.broadcast %cst_19 : f32 to vector<16x64xf32>
    %131 = arith.addf %130, %129 : vector<16x64xf32>
    %132 = arith.divf %130, %131 : vector<16x64xf32>
    %133 = vector.extract_strided_slice %132 {offsets = [0, 0], sizes = [16, 32], strides = [1, 1]} : vector<16x64xf32> to vector<16x32xf32>
    %134 = vector.extract_strided_slice %132 {offsets = [0, 32], sizes = [16, 32], strides = [1, 1]} : vector<16x64xf32> to vector<16x32xf32>
    %135 = vector.extract_strided_slice %123 {offsets = [0, 64], sizes = [16, 32], strides = [1, 1]} : vector<16x96xf32> to vector<16x32xf32>
    %136 = vector.extract_strided_slice %124 {offsets = [0, 64], sizes = [16, 32], strides = [1, 1]} : vector<16x96xf32> to vector<16x32xf32>
    %137 = arith.addf %136, %4 : vector<16x32xf32>
    %138 = arith.mulf %133, %137 : vector<16x32xf32>
    %139 = arith.addf %135, %138 : vector<16x32xf32>
    %140 = math.tanh %139 : vector<16x32xf32>
    %141 = arith.subf %115, %140 : vector<16x32xf32>
    %142 = arith.mulf %134, %141 : vector<16x32xf32>
    %143 = arith.addf %140, %142 : vector<16x32xf32>
    %144 = vector.extract_strided_slice %143 {offsets = [0, 0], sizes = [8, 32], strides = [1, 1]} : vector<16x32xf32> to vector<8x32xf32>
    %145 = vector.extract_strided_slice %143 {offsets = [8, 0], sizes = [8, 32], strides = [1, 1]} : vector<16x32xf32> to vector<8x32xf32>
    %146 = tpu.concatenate %144, %145 in 0 : vector<8x32xf32>, vector<8x32xf32> -> vector<16x32xf32>
    %147 = tpu.concatenate %146, %146 in 1 : vector<16x32xf32>, vector<16x32xf32> -> vector<16x64xf32>
    %148 = arith.mulf %147, %29 : vector<16x64xf32>
    %cst_20 = arith.constant dense<0.000000e+00> : vector<16x192xf32>
    %149 = tpu.matmul %148, %1, %cst_20 {dimension_numbers = #tpu.dot_dimension_numbers<[1], [0], [0], [1], [0, 0, 1, 1], [], []>} : vector<16x64xf32>, vector<64x192xf32>, vector<16x192xf32> -> vector<16x192xf32>
    %150 = vector.extract_strided_slice %149 {offsets = [0, 96], sizes = [8, 96], strides = [1, 1]} : vector<16x192xf32> to vector<8x96xf32>
    %151 = vector.broadcast %6 : vector<1x96xf32> to vector<8x96xf32>
    %152 = arith.addf %150, %151 : vector<8x96xf32>
    %153 = vector.extract_strided_slice %13 {offsets = [32, 0], sizes = [8, 96], strides = [1, 1]} : vector<64x96xf32> to vector<8x96xf32>
    %154 = tpu.concatenate %153, %152 in 0 : vector<8x96xf32>, vector<8x96xf32> -> vector<16x96xf32>
    %155 = vector.extract_strided_slice %149 {offsets = [0, 0], sizes = [16, 96], strides = [1, 1]} : vector<16x192xf32> to vector<16x96xf32>
    %156 = vector.extract_strided_slice %154 {offsets = [0, 0], sizes = [16, 64], strides = [1, 1]} : vector<16x96xf32> to vector<16x64xf32>
    %157 = vector.extract_strided_slice %155 {offsets = [0, 0], sizes = [16, 64], strides = [1, 1]} : vector<16x96xf32> to vector<16x64xf32>
    %158 = arith.addf %156, %157 : vector<16x64xf32>
    %159 = arith.negf %158 : vector<16x64xf32>
    %160 = math.exp %159 : vector<16x64xf32>
    %cst_21 = arith.constant 1.000000e+00 : f32
    %161 = vector.broadcast %cst_21 : f32 to vector<16x64xf32>
    %162 = arith.addf %161, %160 : vector<16x64xf32>
    %163 = arith.divf %161, %162 : vector<16x64xf32>
    %164 = vector.extract_strided_slice %163 {offsets = [0, 0], sizes = [16, 32], strides = [1, 1]} : vector<16x64xf32> to vector<16x32xf32>
    %165 = vector.extract_strided_slice %163 {offsets = [0, 32], sizes = [16, 32], strides = [1, 1]} : vector<16x64xf32> to vector<16x32xf32>
    %166 = vector.extract_strided_slice %154 {offsets = [0, 64], sizes = [16, 32], strides = [1, 1]} : vector<16x96xf32> to vector<16x32xf32>
    %167 = vector.extract_strided_slice %155 {offsets = [0, 64], sizes = [16, 32], strides = [1, 1]} : vector<16x96xf32> to vector<16x32xf32>
    %168 = arith.addf %167, %4 : vector<16x32xf32>
    %169 = arith.mulf %164, %168 : vector<16x32xf32>
    %170 = arith.addf %166, %169 : vector<16x32xf32>
    %171 = math.tanh %170 : vector<16x32xf32>
    %172 = arith.subf %146, %171 : vector<16x32xf32>
    %173 = arith.mulf %165, %172 : vector<16x32xf32>
    %174 = arith.addf %171, %173 : vector<16x32xf32>
    %175 = vector.extract_strided_slice %174 {offsets = [0, 0], sizes = [8, 32], strides = [1, 1]} : vector<16x32xf32> to vector<8x32xf32>
    %176 = vector.extract_strided_slice %174 {offsets = [8, 0], sizes = [8, 32], strides = [1, 1]} : vector<16x32xf32> to vector<8x32xf32>
    %177 = tpu.concatenate %175, %176 in 0 : vector<8x32xf32>, vector<8x32xf32> -> vector<16x32xf32>
    %178 = tpu.concatenate %177, %177 in 1 : vector<16x32xf32>, vector<16x32xf32> -> vector<16x64xf32>
    %179 = arith.mulf %178, %29 : vector<16x64xf32>
    %cst_22 = arith.constant dense<0.000000e+00> : vector<16x192xf32>
    %180 = tpu.matmul %179, %1, %cst_22 {dimension_numbers = #tpu.dot_dimension_numbers<[1], [0], [0], [1], [0, 0, 1, 1], [], []>} : vector<16x64xf32>, vector<64x192xf32>, vector<16x192xf32> -> vector<16x192xf32>
    %181 = vector.extract_strided_slice %180 {offsets = [0, 96], sizes = [8, 96], strides = [1, 1]} : vector<16x192xf32> to vector<8x96xf32>
    %182 = vector.broadcast %6 : vector<1x96xf32> to vector<8x96xf32>
    %183 = arith.addf %181, %182 : vector<8x96xf32>
    %184 = vector.extract_strided_slice %13 {offsets = [40, 0], sizes = [8, 96], strides = [1, 1]} : vector<64x96xf32> to vector<8x96xf32>
    %185 = tpu.concatenate %184, %183 in 0 : vector<8x96xf32>, vector<8x96xf32> -> vector<16x96xf32>
    %186 = vector.extract_strided_slice %180 {offsets = [0, 0], sizes = [16, 96], strides = [1, 1]} : vector<16x192xf32> to vector<16x96xf32>
    %187 = vector.extract_strided_slice %185 {offsets = [0, 0], sizes = [16, 64], strides = [1, 1]} : vector<16x96xf32> to vector<16x64xf32>
    %188 = vector.extract_strided_slice %186 {offsets = [0, 0], sizes = [16, 64], strides = [1, 1]} : vector<16x96xf32> to vector<16x64xf32>
    %189 = arith.addf %187, %188 : vector<16x64xf32>
    %190 = arith.negf %189 : vector<16x64xf32>
    %191 = math.exp %190 : vector<16x64xf32>
    %cst_23 = arith.constant 1.000000e+00 : f32
    %192 = vector.broadcast %cst_23 : f32 to vector<16x64xf32>
    %193 = arith.addf %192, %191 : vector<16x64xf32>
    %194 = arith.divf %192, %193 : vector<16x64xf32>
    %195 = vector.extract_strided_slice %194 {offsets = [0, 0], sizes = [16, 32], strides = [1, 1]} : vector<16x64xf32> to vector<16x32xf32>
    %196 = vector.extract_strided_slice %194 {offsets = [0, 32], sizes = [16, 32], strides = [1, 1]} : vector<16x64xf32> to vector<16x32xf32>
    %197 = vector.extract_strided_slice %185 {offsets = [0, 64], sizes = [16, 32], strides = [1, 1]} : vector<16x96xf32> to vector<16x32xf32>
    %198 = vector.extract_strided_slice %186 {offsets = [0, 64], sizes = [16, 32], strides = [1, 1]} : vector<16x96xf32> to vector<16x32xf32>
    %199 = arith.addf %198, %4 : vector<16x32xf32>
    %200 = arith.mulf %195, %199 : vector<16x32xf32>
    %201 = arith.addf %197, %200 : vector<16x32xf32>
    %202 = math.tanh %201 : vector<16x32xf32>
    %203 = arith.subf %177, %202 : vector<16x32xf32>
    %204 = arith.mulf %196, %203 : vector<16x32xf32>
    %205 = arith.addf %202, %204 : vector<16x32xf32>
    %206 = vector.extract_strided_slice %205 {offsets = [0, 0], sizes = [8, 32], strides = [1, 1]} : vector<16x32xf32> to vector<8x32xf32>
    %207 = vector.extract_strided_slice %205 {offsets = [8, 0], sizes = [8, 32], strides = [1, 1]} : vector<16x32xf32> to vector<8x32xf32>
    %208 = tpu.concatenate %206, %207 in 0 : vector<8x32xf32>, vector<8x32xf32> -> vector<16x32xf32>
    %209 = tpu.concatenate %208, %208 in 1 : vector<16x32xf32>, vector<16x32xf32> -> vector<16x64xf32>
    %210 = arith.mulf %209, %29 : vector<16x64xf32>
    %cst_24 = arith.constant dense<0.000000e+00> : vector<16x192xf32>
    %211 = tpu.matmul %210, %1, %cst_24 {dimension_numbers = #tpu.dot_dimension_numbers<[1], [0], [0], [1], [0, 0, 1, 1], [], []>} : vector<16x64xf32>, vector<64x192xf32>, vector<16x192xf32> -> vector<16x192xf32>
    %212 = vector.extract_strided_slice %211 {offsets = [0, 96], sizes = [8, 96], strides = [1, 1]} : vector<16x192xf32> to vector<8x96xf32>
    %213 = vector.broadcast %6 : vector<1x96xf32> to vector<8x96xf32>
    %214 = arith.addf %212, %213 : vector<8x96xf32>
    %215 = vector.extract_strided_slice %13 {offsets = [48, 0], sizes = [8, 96], strides = [1, 1]} : vector<64x96xf32> to vector<8x96xf32>
    %216 = tpu.concatenate %215, %214 in 0 : vector<8x96xf32>, vector<8x96xf32> -> vector<16x96xf32>
    %217 = vector.extract_strided_slice %211 {offsets = [0, 0], sizes = [16, 96], strides = [1, 1]} : vector<16x192xf32> to vector<16x96xf32>
    %218 = vector.extract_strided_slice %216 {offsets = [0, 0], sizes = [16, 64], strides = [1, 1]} : vector<16x96xf32> to vector<16x64xf32>
    %219 = vector.extract_strided_slice %217 {offsets = [0, 0], sizes = [16, 64], strides = [1, 1]} : vector<16x96xf32> to vector<16x64xf32>
    %220 = arith.addf %218, %219 : vector<16x64xf32>
    %221 = arith.negf %220 : vector<16x64xf32>
    %222 = math.exp %221 : vector<16x64xf32>
    %cst_25 = arith.constant 1.000000e+00 : f32
    %223 = vector.broadcast %cst_25 : f32 to vector<16x64xf32>
    %224 = arith.addf %223, %222 : vector<16x64xf32>
    %225 = arith.divf %223, %224 : vector<16x64xf32>
    %226 = vector.extract_strided_slice %225 {offsets = [0, 0], sizes = [16, 32], strides = [1, 1]} : vector<16x64xf32> to vector<16x32xf32>
    %227 = vector.extract_strided_slice %225 {offsets = [0, 32], sizes = [16, 32], strides = [1, 1]} : vector<16x64xf32> to vector<16x32xf32>
    %228 = vector.extract_strided_slice %216 {offsets = [0, 64], sizes = [16, 32], strides = [1, 1]} : vector<16x96xf32> to vector<16x32xf32>
    %229 = vector.extract_strided_slice %217 {offsets = [0, 64], sizes = [16, 32], strides = [1, 1]} : vector<16x96xf32> to vector<16x32xf32>
    %230 = arith.addf %229, %4 : vector<16x32xf32>
    %231 = arith.mulf %226, %230 : vector<16x32xf32>
    %232 = arith.addf %228, %231 : vector<16x32xf32>
    %233 = math.tanh %232 : vector<16x32xf32>
    %234 = arith.subf %208, %233 : vector<16x32xf32>
    %235 = arith.mulf %227, %234 : vector<16x32xf32>
    %236 = arith.addf %233, %235 : vector<16x32xf32>
    %237 = vector.extract_strided_slice %236 {offsets = [0, 0], sizes = [8, 32], strides = [1, 1]} : vector<16x32xf32> to vector<8x32xf32>
    %238 = vector.extract_strided_slice %236 {offsets = [8, 0], sizes = [8, 32], strides = [1, 1]} : vector<16x32xf32> to vector<8x32xf32>
    %239 = tpu.concatenate %237, %238 in 0 : vector<8x32xf32>, vector<8x32xf32> -> vector<16x32xf32>
    %240 = tpu.concatenate %239, %239 in 1 : vector<16x32xf32>, vector<16x32xf32> -> vector<16x64xf32>
    %241 = arith.mulf %240, %29 : vector<16x64xf32>
    %cst_26 = arith.constant dense<0.000000e+00> : vector<16x192xf32>
    %242 = tpu.matmul %241, %1, %cst_26 {dimension_numbers = #tpu.dot_dimension_numbers<[1], [0], [0], [1], [0, 0, 1, 1], [], []>} : vector<16x64xf32>, vector<64x192xf32>, vector<16x192xf32> -> vector<16x192xf32>
    %243 = vector.extract_strided_slice %242 {offsets = [0, 96], sizes = [8, 96], strides = [1, 1]} : vector<16x192xf32> to vector<8x96xf32>
    %244 = vector.broadcast %6 : vector<1x96xf32> to vector<8x96xf32>
    %245 = arith.addf %243, %244 : vector<8x96xf32>
    %246 = vector.extract_strided_slice %13 {offsets = [56, 0], sizes = [8, 96], strides = [1, 1]} : vector<64x96xf32> to vector<8x96xf32>
    %247 = tpu.concatenate %246, %245 in 0 : vector<8x96xf32>, vector<8x96xf32> -> vector<16x96xf32>
    %248 = vector.extract_strided_slice %242 {offsets = [0, 0], sizes = [16, 96], strides = [1, 1]} : vector<16x192xf32> to vector<16x96xf32>
    %249 = vector.extract_strided_slice %247 {offsets = [0, 0], sizes = [16, 64], strides = [1, 1]} : vector<16x96xf32> to vector<16x64xf32>
    %250 = vector.extract_strided_slice %248 {offsets = [0, 0], sizes = [16, 64], strides = [1, 1]} : vector<16x96xf32> to vector<16x64xf32>
    %251 = arith.addf %249, %250 : vector<16x64xf32>
    %252 = arith.negf %251 : vector<16x64xf32>
    %253 = math.exp %252 : vector<16x64xf32>
    %cst_27 = arith.constant 1.000000e+00 : f32
    %254 = vector.broadcast %cst_27 : f32 to vector<16x64xf32>
    %255 = arith.addf %254, %253 : vector<16x64xf32>
    %256 = arith.divf %254, %255 : vector<16x64xf32>
    %257 = vector.extract_strided_slice %256 {offsets = [0, 0], sizes = [16, 32], strides = [1, 1]} : vector<16x64xf32> to vector<16x32xf32>
    %258 = vector.extract_strided_slice %256 {offsets = [0, 32], sizes = [16, 32], strides = [1, 1]} : vector<16x64xf32> to vector<16x32xf32>
    %259 = vector.extract_strided_slice %247 {offsets = [0, 64], sizes = [16, 32], strides = [1, 1]} : vector<16x96xf32> to vector<16x32xf32>
    %260 = vector.extract_strided_slice %248 {offsets = [0, 64], sizes = [16, 32], strides = [1, 1]} : vector<16x96xf32> to vector<16x32xf32>
    %261 = arith.addf %260, %4 : vector<16x32xf32>
    %262 = arith.mulf %257, %261 : vector<16x32xf32>
    %263 = arith.addf %259, %262 : vector<16x32xf32>
    %264 = math.tanh %263 : vector<16x32xf32>
    %265 = arith.subf %239, %264 : vector<16x32xf32>
    %266 = arith.mulf %258, %265 : vector<16x32xf32>
    %267 = arith.addf %264, %266 : vector<16x32xf32>
    %268 = vector.extract_strided_slice %267 {offsets = [0, 0], sizes = [8, 32], strides = [1, 1]} : vector<16x32xf32> to vector<8x32xf32>
    %269 = vector.extract_strided_slice %267 {offsets = [8, 0], sizes = [8, 32], strides = [1, 1]} : vector<16x32xf32> to vector<8x32xf32>
    %270 = tpu.concatenate %268, %269 in 0 : vector<8x32xf32>, vector<8x32xf32> -> vector<16x32xf32>
    %271 = tpu.concatenate %270, %270 in 1 : vector<16x32xf32>, vector<16x32xf32> -> vector<16x64xf32>
    %272 = arith.mulf %271, %29 : vector<16x64xf32>
    %cst_28 = arith.constant dense<0.000000e+00> : vector<16x192xf32>
    %273 = tpu.matmul %272, %1, %cst_28 {dimension_numbers = #tpu.dot_dimension_numbers<[1], [0], [0], [1], [0, 0, 1, 1], [], []>} : vector<16x64xf32>, vector<64x192xf32>, vector<16x192xf32> -> vector<16x192xf32>
    %274 = vector.extract_strided_slice %273 {offsets = [0, 96], sizes = [8, 96], strides = [1, 1]} : vector<16x192xf32> to vector<8x96xf32>
    %275 = vector.broadcast %6 : vector<1x96xf32> to vector<8x96xf32>
    %276 = arith.addf %274, %275 : vector<8x96xf32>
    %277 = vector.extract_strided_slice %273 {offsets = [8, 0], sizes = [8, 96], strides = [1, 1]} : vector<16x192xf32> to vector<8x96xf32>
    %278 = vector.extract_strided_slice %4 {offsets = [8, 0], sizes = [8, 32], strides = [1, 1]} : vector<16x32xf32> to vector<8x32xf32>
    %279 = vector.extract_strided_slice %276 {offsets = [0, 0], sizes = [8, 64], strides = [1, 1]} : vector<8x96xf32> to vector<8x64xf32>
    %280 = vector.extract_strided_slice %277 {offsets = [0, 0], sizes = [8, 64], strides = [1, 1]} : vector<8x96xf32> to vector<8x64xf32>
    %281 = arith.addf %279, %280 : vector<8x64xf32>
    %282 = arith.negf %281 : vector<8x64xf32>
    %283 = math.exp %282 : vector<8x64xf32>
    %cst_29 = arith.constant 1.000000e+00 : f32
    %284 = vector.broadcast %cst_29 : f32 to vector<8x64xf32>
    %285 = arith.addf %284, %283 : vector<8x64xf32>
    %286 = arith.divf %284, %285 : vector<8x64xf32>
    %287 = vector.extract_strided_slice %286 {offsets = [0, 0], sizes = [8, 32], strides = [1, 1]} : vector<8x64xf32> to vector<8x32xf32>
    %288 = vector.extract_strided_slice %286 {offsets = [0, 32], sizes = [8, 32], strides = [1, 1]} : vector<8x64xf32> to vector<8x32xf32>
    %289 = vector.extract_strided_slice %276 {offsets = [0, 64], sizes = [8, 32], strides = [1, 1]} : vector<8x96xf32> to vector<8x32xf32>
    %290 = vector.extract_strided_slice %277 {offsets = [0, 64], sizes = [8, 32], strides = [1, 1]} : vector<8x96xf32> to vector<8x32xf32>
    %291 = arith.addf %290, %278 : vector<8x32xf32>
    %292 = arith.mulf %287, %291 : vector<8x32xf32>
    %293 = arith.addf %289, %292 : vector<8x32xf32>
    %294 = math.tanh %293 : vector<8x32xf32>
    %295 = arith.subf %269, %294 : vector<8x32xf32>
    %296 = arith.mulf %288, %295 : vector<8x32xf32>
    %297 = arith.addf %294, %296 : vector<8x32xf32>
    %cst_30 = arith.constant dense<0.000000e+00> : vector<8x16xf32>
    %298 = tpu.matmul %297, %2, %cst_30 {dimension_numbers = #tpu.dot_dimension_numbers<[1], [0], [0], [1], [0, 0, 1, 1], [], []>} : vector<8x32xf32>, vector<32x16xf32>, vector<8x16xf32> -> vector<8x16xf32>
    %299 = vector.broadcast %7 : vector<1x16xf32> to vector<8x16xf32>
    %300 = arith.addf %298, %299 : vector<8x16xf32>
    %cst_31 = arith.constant 0.000000e+00 : f32
    %301 = vector.broadcast %cst_31 : f32 to vector<8x16xf32>
    %302 = arith.maximumf %300, %301 : vector<8x16xf32>
    %303 = vector.broadcast %8 : vector<1x16xf32> to vector<8x16xf32>
    %304 = arith.mulf %302, %303 : vector<8x16xf32>
    %cst_32 = arith.constant dense<0.000000e+00> : vector<8xf32>
    %305 = vector.multi_reduction <add>, %304, %cst_32 [1] : vector<8x16xf32> to vector<8xf32>
    %306 = vector.shape_cast %305 : vector<8xf32> to vector<8x1xf32>
    %307 = vector.broadcast %9 : vector<1x1xf32> to vector<8x1xf32>
    %308 = arith.addf %306, %307 : vector<8x1xf32>
    %309 = arith.negf %308 : vector<8x1xf32>
    %310 = math.exp %309 : vector<8x1xf32>
    %cst_33 = arith.constant 1.000000e+00 : f32
    %311 = vector.broadcast %cst_33 : f32 to vector<8x1xf32>
    %312 = arith.addf %311, %310 : vector<8x1xf32>
    %313 = arith.divf %311, %312 : vector<8x1xf32>
    %314 = vector.extract_strided_slice %313 {offsets = [0, 0], sizes = [2, 1], strides = [1, 1]} : vector<8x1xf32> to vector<2x1xf32>
    %c0_34 = arith.constant 0 : index
    %c0_35 = arith.constant 0 : index
    %315 = vector.load %arg3[%c0_34, %c0_35] : memref<2x1xf32, #tpu.memory_space<vmem>>, vector<2x1xf32>
    tpu.vector_store %arg3[%c0_34, %c0_35], %314 {strides = array<i32>} : memref<2x1xf32, #tpu.memory_space<vmem>>, vector<2x1xf32>,
    return
  }
}

</mosaic_0001>

<bundles_post_ra>
// kernel: confidence_gru_forward.1
= control target key start
LH: loop header
LB: loop body
LE: loop exit
PB: predicated region body
PF: predicated region fallthrough
CT: control target
= control target key end

     0   :  { %vm50_vm0 = vcmask 64512   ;;  %v46_v3 = vlaneseq  ;;  %s1893_s22 = smov 64   ;;  %s1894_s23 = smov 96   ;;  %v1895_v21 = vmov 0.0   ;;  %vm239_vm2 = vcmask 261120   ;;  %s2555_s1 = inlined_call_operand.vmem [shape: f32[104,192], index: 1, kind: input, shape index: {}]   ;;  %s2556_s0 = inlined_call_operand.vmem [shape: f32[64,8], index: 0, kind: input, shape index: {}]   ;;  %s2557_s2 = inlined_call_operand.vmem [shape: f32[24,96], index: 2, kind: input, shape index: {}]   ;;  %s2558_s3 = inlined_call_operand.vmem [shape: f32[2,1], index: 3, kind: output, shape index: {}]  }
   0x1   :  { %v14_v0 = vld [vmem:[%s2555_s1] sm:$0xff]  ;;  %v39_v2 = vld [vmem:[%s2556_s0 + $0x8] sm:$0xff]  ;;  %v1936_v6 = vld [vmem:[%s2557_s2 + $0x10] sm:$0xff]  ;;  %315 = vmatprep.mubr.f32.mxu1 %v1895_v21  ;;  %s1896_s15 = smov 32   ;;  %vm244_vm4 = vcmask 523264   ;;  %vm1897_vm5 = vmmov 0  }
   0x2   :  { %v38_v1 = vld [vmem:[%s2556_s0] sm:$0xff]  ;;  %1743 = vmatprep.subr.mxu0 %v14_v0  ;;  %v1930_v4 = vshrl.u32 %v46_v3, 7  ;;  %v1956_v22 = vld [vmem:[%s2555_s1 + $0x88] sm:$0xff]  ;;  %v1966_v24 = vld [vmem:[%s2555_s1 + $0x78] sm:$0xff]  ;;  %v184_v45 = vand.u32 127, %v46_v3  ;;  %vm1665_vm6 = vcmask 130048  }
   0x3   :  { %1745 = vmatprep.mubr.msk.f32.mxu0 %vm50_vm0, %v38_v1  ;;  %1744 = vmatpush3.msra.mxu0 %v14_v0  ;;  %v1947_v14 = vld [vmem:[%s2557_s2] sm:$0xff]  ;;  %v1972_v25 = vld [vmem:[%s2555_s1 + $0x70] sm:$0xff]  ;;  %v1979_v26 = vld [vmem:[%s2555_s1 + $0x68] sm:$0xff]  ;;  %vm1680_vm7 = vcmask 1024  }
   0x4   :  { %1746 = vmatmul.mubr.msk.f32.vlgmr.msra.gmra.mxu0 %vm50_vm0, %v39_v2  ;;  %v48_v5 = vsub.s32 0, %v1930_v4  ;;  %v1961_v23 = vld [vmem:[%s2555_s1 + $0x80] sm:$0xff]  ;;  %267 = vmatprep.subr.mxu1 %v1956_v22  ;;  %v1993_v29 = vld [vmem:[%s2555_s1 + $0x58] sm:$0xff]  ;;  %v2000_v31 = vld [vmem:[%s2555_s1 + $0x50] sm:$0xff]  ;;  %v329_v42 = vsub.s32 1, %v1930_v4  ;;  %vm187_vm1 = vcmp.lt.s32.totalorder %v184_v45, 32 }
   0x5   :  { %453 = vmatprep.subr.mxu0 %v1956_v22  ;;  %268 = vmatpush1.msra.mxu1 %v1961_v23  ;;  %v1986_v27 = vld [vmem:[%s2555_s1 + $0x60] sm:$0xff]  ;;  %v2007_v32 = vld [vmem:[%s2555_s1 + $0x48] sm:$0xff]  ;;  %v2021_v34 = vld [vmem:[%s2555_s1 + $0x38] sm:$0xff]  ;;  %v2089_v46 = vsel %vm187_vm1, 1.0, %v1895_v21  ;;  %vm192_vm3 = vcmp.ge.s32.totalorder %v184_v45, 32 }
   0x6   :  { %v1941_v8 = vrot.slane %v1936_v6, %v48_v5  ;;  %454 = vmatpush1.msra.mxu0 %v1961_v23  ;;  %269 = vmatprep.subr.mxu1 %v1966_v24  ;;  %v2015_v33 = vld [vmem:[%s2555_s1 + $0x40] sm:$0xff]  ;;  %v2028_v35 = vld [vmem:[%s2555_s1 + $0x30] sm:$0xff]  ;;  %v2035_v36 = vld [vmem:[%s2555_s1 + $0x28] sm:$0xff]  ;;  %v330_v43 = vrot.slane %v1936_v6, %v329_v42  ;;  %v2094_v51 = vsel %vm192_vm3, 1.0, %v1895_v21 }
   0x7   :  { %455 = vmatprep.subr.mxu0 %v1966_v24  ;;  %270 = vmatpush1.msra.mxu1 %v1972_v25  ;;  %v2048_v37 = vld [vmem:[%s2555_s1 + $0x20] sm:$0xff]  ;;  %v2054_v38 = vld [vmem:[%s2555_s1 + $0x18] sm:$0xff]  ;;  %v2061_v39 = vld [vmem:[%s2555_s1 + $0x10] sm:$0xff] }
   0x8   :  { %456 = vmatpush1.msra.mxu0 %v1972_v25  ;;  %271 = vmatprep.subr.mxu1 %v1979_v26  ;;  %v36_v44 = vld [vmem:[%s2557_s2 + $0x8] sm:$0xff] }
   0x9   :  { %457 = vmatprep.subr.mxu0 %v1979_v26  ;;  %272 = vmatpush1.msra.mxu1 %v1986_v27 }
   0xa   :  { %458 = vmatpush1.msra.mxu0 %v1986_v27  ;;  %273 = vmatprep.subr.mxu1 %v1993_v29 }
   0xb   :  { %274 = vmatpush1.msra.mxu1 %v2000_v31  ;;  %459 = vmatprep.subr.mxu0 %v1993_v29 }
   0xc   :  { %275 = vmatprep.subr.mxu1 %v2007_v32  ;;  %460 = vmatpush1.msra.mxu0 %v2000_v31 }
   0xd   :  { %276 = vmatpush1.msra.mxu1 %v2015_v33  ;;  %461 = vmatprep.subr.mxu0 %v2007_v32 }
   0xe   :  { %277 = vmatprep.subr.mxu1 %v2021_v34  ;;  %462 = vmatpush1.msra.mxu0 %v2015_v33 }
   0xf   :  { %278 = vmatpush1.msra.mxu1 %v2028_v35  ;;  %463 = vmatprep.subr.mxu0 %v2021_v34 }
  0x10   :  { %279 = vmatprep.subr.mxu1 %v2035_v36  ;;  %464 = vmatpush1.msra.mxu0 %v2028_v35 }
  0x11   :  { %465 = vmatprep.subr.mxu0 %v2035_v36  ;;  %280 = vmatpush1.msra.mxu1 %v2048_v37 }
  0x12   :  { %466 = vmatpush1.msra.mxu0 %v2048_v37  ;;  %281 = vmatprep.subr.mxu1 %v2054_v38 }
  0x13   :  { %467 = vmatprep.subr.mxu0 %v2054_v38  ;;  %282 = vmatpush1.msra.mxu1 %v2061_v39 }
  0x14   :  { %468 = vmatpush1.msra.mxu0 %v2061_v39  ;;  %623 = vmatprep.subr.mxu1 %v1956_v22 }
  0x15   :  { %793 = vmatprep.subr.mxu0 %v1956_v22 }
  0xc4   :  { %v1938_v7 = vpop.f32.mrf.mxu0 }
  0xc5   :  { %v147_v3 = vadd.f32 %v1938_v7, %v1941_v8 }
  0xc6   :  { %v141_v9 = vpop.f32.mrf.mxu0 }
  0xc7   :  { %v142_v10 = vadd.f32 %v141_v9, %v1941_v8 }
  0xc9   :  { %v1694_v11 = vmul.f32 -1.442695, %v142_v10 }
  0xcb   :  { %1773 = vpow2.f32 %v1694_v11 }
  0xd8   :  { %v1774_v12 = vpop.eup %1773 }
  0xd9   :  { %v203_v13 = vadd.f32 1.0, %v1774_v12 }
  0xdb   :  { %1775 = vrcp.f32 %v203_v13 }
  0xe8   :  { %v1776_v15 = vpop.eup %1775 }
  0xe9   :  { %v207_v16 = vmul.f32 %v1776_v15, %v1947_v14 }
  0xeb   :  { %209 = vrot.lane.b32.xlu0 %v207_v16, %s1893_s22 }
 0x15d   :  { %v210_v17 = vpop.permute.xlu0 %209 }
 0x15e   :  { %v212_v18 = vadd.f32 %v210_v17, %v142_v10 }
 0x160   :  { %1777 = vtanh.f32 %v212_v18 }
 0x16d   :  { %v1778_v19 = vpop.eup %1777 }
 0x16e   :  { %v214_v20 = vsub.f32 0.0, %v1778_v19 }
 0x170   :  { %216 = vrot.lane.b32.xlu0 %v214_v20, %s1894_s23 }
 0x1e2   :  { %v217_v28 = vpop.permute.xlu0 %216 }
 0x1e3   :  { %v219_v30 = vmul.f32 %v1776_v15, %v217_v28 }
 0x1e5   :  { %221 = vrot.lane.b32.xlu1 %v219_v30, %s1896_s15 }
 0x257   :  { %v222_v40 = vpop.permute.xlu1 %221 }
 0x258   :  { %v2068_v41 = vadd.f32 %v1778_v19, %v222_v40 }
 0x25a   :  { %233 = vrot.lane.b32.xlu0 %v2068_v41, %s1894_s23  ;;  %227 = vrot.lane.b32.xlu1 %v2068_v41, %s1893_s22 }
 0x25e   :  { %235 = vrot.lane.b32.xlu0 %v1895_v21, %s1894_s23  ;;  %229 = vrot.lane.b32.xlu1 %v1895_v21, %s1893_s22 }
 0x262   :  { %332 = vrot.lane.b32.xlu0 %v330_v43, %s1894_s23  ;;  %361 = vrot.lane.b32.xlu1 %v1947_v14, %s1893_s22 }
 0x266   :  { %363 = vrot.lane.b32.xlu1 %v36_v44, %s1893_s22 }
 0x2cc   :  { %v234_v47 = vpop.permute.xlu0 %233  ;;  %v228_v48 = vpop.permute.xlu1 %227 }
 0x2cd   :  { %v240_v49 = vsel %vm239_vm2, %v228_v48, %v234_v47 }
 0x2ce   :  { %v242_v50 = vmul.f32 %v240_v49, %v2089_v46 }
 0x2d0   :  { %1695 = vmatmul.mubr.msk.f32.vlgmr.msra.gmra.mxu1 %vm244_vm4, %v242_v50  ;;  %v236_v52 = vpop.permute.xlu0 %235  ;;  %v230_v53 = vpop.permute.xlu1 %229 }
 0x2d1   :  { %v241_v54 = vsel %vm239_vm2, %v230_v53, %v236_v52  ;;  %321 = vmatprep.mubr.f32.mxu1 %v1895_v21  ;;  %624 = vmatpush1.msra.mxu1 %v1961_v23  ;;  %v40_v53 = vld [vmem:[%s2556_s0 + $0x10] sm:$0xff] }
 0x2d2   :  { %v243_v55 = vmul.f32 %v241_v54, %v2094_v51  ;;  %625 = vmatprep.subr.mxu1 %v1966_v24  ;;  %v42_v54 = vld [vmem:[%s2556_s0 + $0x20] sm:$0xff]  ;;  %1748 = vmatprep.mubr.msk.f32.mxu0 %vm50_vm0, %v40_v53 }
 0x2d3   :  { %626 = vmatpush1.msra.mxu1 %v1972_v25 }
 0x2d4   :  { %1696 = vmatmul.mubr.msk.f32.gmra.mxu1 %vm244_vm4, %v243_v55  ;;  %627 = vmatprep.subr.mxu1 %v1979_v26  ;;  %v2118_v56 = vpop.permute.xlu0 %332  ;;  %v2120_v57 = vpop.permute.xlu1 %361  ;;  %v43_v55 = vld [vmem:[%s2556_s0 + $0x28] sm:$0xff] }
 0x2d5   :  { %628 = vmatpush1.msra.mxu1 %v1986_v27  ;;  %671 = vmatprep.mubr.f32.mxu1 %v1895_v21 }
 0x2d6   :  { %629 = vmatprep.subr.mxu1 %v1993_v29 }
 0x2d7   :  { %630 = vmatpush1.msra.mxu1 %v2000_v31 }
 0x2d8   :  { %631 = vmatprep.subr.mxu1 %v2007_v32  ;;  %v2124_v62 = vpop.permute.xlu1 %363 }
 0x2d9   :  { %632 = vmatpush1.msra.mxu1 %v2015_v33 }
 0x2da   :  { %633 = vmatprep.subr.mxu1 %v2021_v34 }
 0x2db   :  { %634 = vmatpush1.msra.mxu1 %v2028_v35 }
 0x2dc   :  { %635 = vmatprep.subr.mxu1 %v2035_v36 }
 0x2dd   :  { %636 = vmatpush1.msra.mxu1 %v2048_v37 }
 0x2de   :  { %637 = vmatprep.subr.mxu1 %v2054_v38 }
 0x2df   :  { %638 = vmatpush1.msra.mxu1 %v2061_v39 }
 0x2e0   :  { %963 = vmatprep.subr.mxu1 %v1956_v22 }
 0x390   :  { %v317_v58 = vpop.f32.mrf.mxu1 }
 0x391   :  { %v335_v59 = vadd.f32 %v2118_v56, %v317_v58  ;;  %v367_v60 = vadd.f32 %v2120_v57, %v317_v58  ;;  %v345_v5 = vadd.f32 %v317_v58, %v147_v3  ;;  %v44_v58 = vld [vmem:[%s2556_s0 + $0x30] sm:$0xff] }
 0x392   :  { %v319_v61 = vpop.f32.mrf.mxu1 }
 0x393   :  { %339 = vrot.lane.b32.xlu1 %v335_v59, %s1896_s15  ;;  %371 = vrot.lane.b32.xlu0 %v367_v60, %s1893_s22  ;;  %v336_v0 = vadd.f32 %v2118_v56, %v319_v61  ;;  %v1697_v6 = vmul.f32 -1.442695, %v345_v5  ;;  %v45_v59 = vld [vmem:[%s2556_s0 + $0x38] sm:$0xff] }
 0x394   :  { %v323_v63 = vpop.f32.mrf.mxu1 }
 0x395   :  { %v368_v1 = vadd.f32 %v2124_v62, %v323_v63  ;;  %1779 = vpow2.f32 %v1697_v6 }
 0x396   :  { %v325_v2 = vpop.f32.mrf.mxu1 }
 0x397   :  { %341 = vrot.lane.b32.xlu0 %v336_v0, %s1896_s15  ;;  %373 = vrot.lane.b32.xlu1 %v368_v1, %s1893_s22 }
 0x3a2   :  { %v1780_v9 = vpop.eup %1779 }
 0x3a3   :  { %v353_v10 = vadd.f32 1.0, %v1780_v9 }
 0x3a5   :  { %1781 = vrcp.f32 %v353_v10 }
 0x3b2   :  { %v1782_v11 = vpop.eup %1781 }
 0x405   :  { %v372_v12 = vpop.permute.xlu0 %371  ;;  %v340_v14 = vpop.permute.xlu1 %339 }
 0x406   :  { %v377_v13 = vmul.f32 %v1782_v11, %v372_v12 }
 0x408   :  { %381 = vrot.lane.b32.xlu0 %v377_v13, %s1893_s22 }
 0x409   :  { %v342_v15 = vpop.permute.xlu0 %341  ;;  %v374_v20 = vpop.permute.xlu1 %373 }
 0x40a   :  { %v343_v16 = vsel %vm239_vm2, %v340_v14, %v342_v15 }
 0x40b   :  { %v346_v17 = vadd.f32 %v343_v16, %v323_v63 }
 0x40d   :  { %v1698_v18 = vmul.f32 -1.442695, %v346_v17 }
 0x40f   :  { %1783 = vpow2.f32 %v1698_v18 }
 0x41c   :  { %v1784_v19 = vpop.eup %1783 }
 0x41d   :  { %v354_v7 = vadd.f32 1.0, %v1784_v19 }
 0x41f   :  { %1785 = vrcp.f32 %v354_v7 }
 0x42c   :  { %v1786_v28 = vpop.eup %1785 }
 0x42d   :  { %v378_v30 = vmul.f32 %v1786_v28, %v374_v20 }
 0x42f   :  { %383 = vrot.lane.b32.xlu1 %v378_v30, %s1893_s22 }
 0x47a   :  { %v382_v40 = vpop.permute.xlu0 %381 }
 0x47b   :  { %v387_v42 = vadd.f32 %v382_v40, %v147_v3 }
 0x47d   :  { %1787 = vtanh.f32 %v387_v42 }
 0x48a   :  { %v1788_v43 = vpop.eup %1787 }
 0x48b   :  { %v391_v44 = vsub.f32 %v2068_v41, %v1788_v43  ;;  %v41_v41 = vld [vmem:[%s2556_s0 + $0x18] sm:$0xff] }
 0x48c   :  { %1749 = vmatmul.mubr.msk.f32.gmra.mxu0 %vm50_vm0, %v41_v41 }
 0x48d   :  { %395 = vrot.lane.b32.xlu0 %v391_v44, %s1894_s23  ;;  %1751 = vmatprep.mubr.msk.f32.mxu0 %vm50_vm0, %v42_v54 }
 0x490   :  { %1752 = vmatmul.mubr.msk.f32.gmra.mxu0 %vm50_vm0, %v43_v55 }
 0x491   :  { %1754 = vmatprep.mubr.msk.f32.mxu0 %vm50_vm0, %v44_v58 }
 0x494   :  { %1755 = vmatmul.mubr.msk.f32.gmra.mxu0 %vm50_vm0, %v45_v59 }
 0x495   :  { %501 = vmatprep.mubr.f32.mxu0 %v1895_v21 }
 0x4a1   :  { %v384_v45 = vpop.permute.xlu1 %383 }
 0x4a2   :  { %v388_v47 = vadd.f32 %v384_v45, %v343_v16 }
 0x4a4   :  { %1789 = vtanh.f32 %v388_v47 }
 0x4b1   :  { %v1790_v48 = vpop.eup %1789 }
 0x4b2   :  { %v392_v49 = vsub.f32 0.0, %v1790_v48 }
 0x4b4   :  { %397 = vrot.lane.b32.xlu1 %v392_v49, %s1894_s23 }
 0x4ff   :  { %v396_v50 = vpop.permute.xlu0 %395 }
 0x500   :  { %v401_v52 = vmul.f32 %v1782_v11, %v396_v50 }
 0x502   :  { %405 = vrot.lane.b32.xlu0 %v401_v52, %s1896_s15 }
 0x526   :  { %v398_v60 = vpop.permute.xlu1 %397 }
 0x527   :  { %v402_v61 = vmul.f32 %v1786_v28, %v398_v60 }
 0x529   :  { %407 = vrot.lane.b32.xlu1 %v402_v61, %s1896_s15 }
 0x54c   :  { %v2203_v14 = vpop.f32.mrf.mxu0 }
 0x54e   :  { %v151_v15 = vpop.f32.mrf.mxu0 }
 0x54f   :  { %v152_v45 = vadd.f32 %v151_v15, %v1941_v8 }
 0x550   :  { %v2205_v16 = vpop.f32.mrf.mxu0 }
 0x552   :  { %v2207_v17 = vpop.f32.mrf.mxu0 }
 0x554   :  { %v2209_v18 = vpop.f32.mrf.mxu0 }
 0x556   :  { %v2211_v19 = vpop.f32.mrf.mxu0 }
 0x574   :  { %v406_v63 = vpop.permute.xlu0 %405 }
 0x575   :  { %v2167_v0 = vadd.f32 %v1788_v43, %v406_v63 }
 0x577   :  { %415 = vrot.lane.b32.xlu0 %v2167_v0, %s1893_s22  ;;  %421 = vrot.lane.b32.xlu1 %v2167_v0, %s1894_s23 }
 0x59b   :  { %v408_v1 = vpop.permute.xlu1 %407 }
 0x59c   :  { %v2173_v2 = vadd.f32 %v1790_v48, %v408_v1 }
 0x59e   :  { %423 = vrot.lane.b32.xlu1 %v2173_v2, %s1894_s23  ;;  %417 = vrot.lane.b32.xlu0 %v2173_v2, %s1893_s22 }
 0x5e9   :  { %v416_v3 = vpop.permute.xlu0 %415  ;;  %v422_v5 = vpop.permute.xlu1 %421 }
 0x5ea   :  { %v427_v6 = vsel %vm239_vm2, %v416_v3, %v422_v5 }
 0x5eb   :  { %v429_v9 = vmul.f32 %v427_v6, %v2089_v46 }
 0x5ed   :  { %1699 = vmatmul.mubr.msk.f32.vlgmr.msra.gmra.mxu0 %vm244_vm4, %v429_v9 }
 0x5ee   :  { %507 = vmatprep.mubr.f32.mxu0 %v1895_v21  ;;  %794 = vmatpush1.msra.mxu0 %v1961_v23 }
 0x5ef   :  { %795 = vmatprep.subr.mxu0 %v1966_v24 }
 0x5f0   :  { %796 = vmatpush1.msra.mxu0 %v1972_v25 }
 0x5f1   :  { %797 = vmatprep.subr.mxu0 %v1979_v26 }
 0x5f2   :  { %798 = vmatpush1.msra.mxu0 %v1986_v27 }
 0x5f3   :  { %799 = vmatprep.subr.mxu0 %v1993_v29 }
 0x5f4   :  { %800 = vmatpush1.msra.mxu0 %v2000_v31 }
 0x5f5   :  { %801 = vmatprep.subr.mxu0 %v2007_v32 }
 0x5f6   :  { %802 = vmatpush1.msra.mxu0 %v2015_v33 }
 0x5f7   :  { %803 = vmatprep.subr.mxu0 %v2021_v34 }
 0x5f8   :  { %804 = vmatpush1.msra.mxu0 %v2028_v35 }
 0x5f9   :  { %805 = vmatprep.subr.mxu0 %v2035_v36 }
 0x5fa   :  { %806 = vmatpush1.msra.mxu0 %v2048_v37 }
 0x5fb   :  { %807 = vmatprep.subr.mxu0 %v2054_v38 }
 0x5fc   :  { %808 = vmatpush1.msra.mxu0 %v2061_v39 }
 0x5fd   :  { %1133 = vmatprep.subr.mxu0 %v1956_v22 }
 0x610   :  { %v418_v10 = vpop.permute.xlu0 %417  ;;  %v424_v11 = vpop.permute.xlu1 %423 }
 0x611   :  { %v428_v12 = vsel %vm239_vm2, %v418_v10, %v424_v11 }
 0x612   :  { %v430_v13 = vmul.f32 %v428_v12, %v2094_v51 }
 0x614   :  { %1700 = vmatmul.mubr.msk.f32.gmra.mxu0 %vm244_vm4, %v430_v13 }
 0x615   :  { %841 = vmatprep.mubr.f32.mxu0 %v1895_v21 }
 0x6ad   :  { %v503_v7 = vpop.f32.mrf.mxu0 }
 0x6ae   :  { %v513_v20 = vadd.f32 %v503_v7, %v2118_v56  ;;  %v537_v28 = vadd.f32 %v503_v7, %v2120_v57  ;;  %v523_v47 = vadd.f32 %v503_v7, %v152_v45 }
 0x6af   :  { %v505_v30 = vpop.f32.mrf.mxu0 }
 0x6b0   :  { %541 = vrot.lane.b32.xlu0 %v537_v28, %s1893_s22  ;;  %517 = vrot.lane.b32.xlu1 %v513_v20, %s1896_s15  ;;  %v514_v40 = vadd.f32 %v505_v30, %v2118_v56  ;;  %v1701_v48 = vmul.f32 -1.442695, %v523_v47 }
 0x6b2   :  { %1791 = vpow2.f32 %v1701_v48 }
 0x6b4   :  { %519 = vrot.lane.b32.xlu0 %v514_v40, %s1896_s15 }
 0x6bf   :  { %v1792_v49 = vpop.eup %1791 }
 0x6c0   :  { %v531_v50 = vadd.f32 1.0, %v1792_v49 }
 0x6c2   :  { %1793 = vrcp.f32 %v531_v50 }
 0x6cf   :  { %v1794_v52 = vpop.eup %1793 }
 0x6d4   :  { %v509_v42 = vpop.f32.mrf.mxu0 }
 0x6d5   :  { %v538_v43 = vadd.f32 %v509_v42, %v2124_v62 }
 0x6d6   :  { %v511_v44 = vpop.f32.mrf.mxu0 }
 0x6d7   :  { %543 = vrot.lane.b32.xlu1 %v538_v43, %s1893_s22 }
 0x722   :  { %v542_v53 = vpop.permute.xlu0 %541  ;;  %v518_v54 = vpop.permute.xlu1 %517 }
 0x723   :  { %v547_v41 = vmul.f32 %v1794_v52, %v542_v53 }
 0x725   :  { %551 = vrot.lane.b32.xlu0 %v547_v41, %s1893_s22 }
 0x726   :  { %v520_v55 = vpop.permute.xlu0 %519 }
 0x727   :  { %v521_v58 = vsel %vm239_vm2, %v518_v54, %v520_v55 }
 0x728   :  { %v524_v59 = vadd.f32 %v521_v58, %v509_v42 }
 0x72a   :  { %v1702_v60 = vmul.f32 -1.442695, %v524_v59 }
 0x72c   :  { %1795 = vpow2.f32 %v1702_v60 }
 0x739   :  { %v1796_v61 = vpop.eup %1795 }
 0x73a   :  { %v532_v63 = vadd.f32 1.0, %v1796_v61 }
 0x73c   :  { %1797 = vrcp.f32 %v532_v63 }
 0x749   :  { %v1798_v1 = vpop.eup %1797  ;;  %v544_v3 = vpop.permute.xlu1 %543 }
 0x74a   :  { %v548_v5 = vmul.f32 %v1798_v1, %v544_v3 }
 0x74c   :  { %553 = vrot.lane.b32.xlu1 %v548_v5, %s1893_s22 }
 0x797   :  { %v552_v6 = vpop.permute.xlu0 %551 }
 0x798   :  { %v557_v9 = vadd.f32 %v552_v6, %v152_v45 }
 0x79a   :  { %1799 = vtanh.f32 %v557_v9 }
 0x7a7   :  { %v1800_v10 = vpop.eup %1799 }
 0x7a8   :  { %v561_v11 = vsub.f32 %v2167_v0, %v1800_v10 }
 0x7aa   :  { %565 = vrot.lane.b32.xlu0 %v561_v11, %s1894_s23 }
 0x7be   :  { %v554_v12 = vpop.permute.xlu1 %553 }
 0x7bf   :  { %v558_v13 = vadd.f32 %v554_v12, %v521_v58 }
 0x7c1   :  { %1801 = vtanh.f32 %v558_v13 }
 0x7ce   :  { %v1802_v15 = vpop.eup %1801 }
 0x7cf   :  { %v562_v7 = vsub.f32 %v2173_v2, %v1802_v15 }
 0x7d1   :  { %567 = vrot.lane.b32.xlu1 %v562_v7, %s1894_s23 }
 0x81c   :  { %v566_v20 = vpop.permute.xlu0 %565 }
 0x81d   :  { %v571_v28 = vmul.f32 %v1794_v52, %v566_v20 }
 0x81f   :  { %575 = vrot.lane.b32.xlu0 %v571_v28, %s1896_s15 }
 0x843   :  { %v568_v30 = vpop.permute.xlu1 %567 }
 0x844   :  { %v572_v40 = vmul.f32 %v1798_v1, %v568_v30  ;;  %v157_v1 = vadd.f32 %v2203_v14, %v1941_v8 }
 0x846   :  { %577 = vrot.lane.b32.xlu1 %v572_v40, %s1896_s15 }
 0x891   :  { %v576_v42 = vpop.permute.xlu0 %575 }
 0x892   :  { %v2231_v0 = vadd.f32 %v1800_v10, %v576_v42 }
 0x894   :  { %585 = vrot.lane.b32.xlu0 %v2231_v0, %s1893_s22  ;;  %591 = vrot.lane.b32.xlu1 %v2231_v0, %s1894_s23 }
 0x8b8   :  { %v578_v2 = vpop.permute.xlu1 %577 }
 0x8b9   :  { %v2237_v43 = vadd.f32 %v1802_v15, %v578_v2 }
 0x8bb   :  { %593 = vrot.lane.b32.xlu1 %v2237_v43, %s1894_s23  ;;  %587 = vrot.lane.b32.xlu0 %v2237_v43, %s1893_s22 }
 0x906   :  { %v586_v44 = vpop.permute.xlu0 %585  ;;  %v592_v45 = vpop.permute.xlu1 %591 }
 0x907   :  { %v597_v47 = vsel %vm239_vm2, %v586_v44, %v592_v45 }
 0x908   :  { %v599_v48 = vmul.f32 %v597_v47, %v2089_v46 }
 0x90a   :  { %1703 = vmatmul.mubr.msk.f32.vlgmr.msra.gmra.mxu1 %vm244_vm4, %v599_v48 }
 0x90b   :  { %677 = vmatprep.mubr.f32.mxu1 %v1895_v21  ;;  %964 = vmatpush1.msra.mxu1 %v1961_v23 }
 0x90c   :  { %965 = vmatprep.subr.mxu1 %v1966_v24 }
 0x90d   :  { %966 = vmatpush1.msra.mxu1 %v1972_v25 }
 0x90e   :  { %967 = vmatprep.subr.mxu1 %v1979_v26 }
 0x90f   :  { %968 = vmatpush1.msra.mxu1 %v1986_v27 }
 0x910   :  { %969 = vmatprep.subr.mxu1 %v1993_v29 }
 0x911   :  { %970 = vmatpush1.msra.mxu1 %v2000_v31 }
 0x912   :  { %971 = vmatprep.subr.mxu1 %v2007_v32 }
 0x913   :  { %972 = vmatpush1.msra.mxu1 %v2015_v33 }
 0x914   :  { %973 = vmatprep.subr.mxu1 %v2021_v34 }
 0x915   :  { %974 = vmatpush1.msra.mxu1 %v2028_v35 }
 0x916   :  { %975 = vmatprep.subr.mxu1 %v2035_v36 }
 0x917   :  { %976 = vmatpush1.msra.mxu1 %v2048_v37 }
 0x918   :  { %977 = vmatprep.subr.mxu1 %v2054_v38 }
 0x919   :  { %978 = vmatpush1.msra.mxu1 %v2061_v39 }
 0x91a   :  { %1303 = vmatprep.subr.mxu1 %v1956_v22 }
 0x92d   :  { %v588_v49 = vpop.permute.xlu0 %587  ;;  %v594_v50 = vpop.permute.xlu1 %593 }
 0x92e   :  { %v598_v52 = vsel %vm239_vm2, %v588_v49, %v594_v50 }
 0x92f   :  { %v600_v53 = vmul.f32 %v598_v52, %v2094_v51 }
 0x931   :  { %1704 = vmatmul.mubr.msk.f32.gmra.mxu1 %vm244_vm4, %v600_v53 }
 0x932   :  { %1011 = vmatprep.mubr.f32.mxu1 %v1895_v21 }
 0x9ca   :  { %v673_v41 = vpop.f32.mrf.mxu1 }
 0x9cb   :  { %v683_v54 = vadd.f32 %v673_v41, %v2118_v56  ;;  %v707_v55 = vadd.f32 %v673_v41, %v2120_v57  ;;  %v693_v3 = vadd.f32 %v673_v41, %v157_v1 }
 0x9cc   :  { %v675_v58 = vpop.f32.mrf.mxu1 }
 0x9cd   :  { %711 = vrot.lane.b32.xlu0 %v707_v55, %s1893_s22  ;;  %687 = vrot.lane.b32.xlu1 %v683_v54, %s1896_s15  ;;  %v684_v59 = vadd.f32 %v675_v58, %v2118_v56  ;;  %v1705_v5 = vmul.f32 -1.442695, %v693_v3 }
 0x9cf   :  { %1803 = vpow2.f32 %v1705_v5 }
 0x9d1   :  { %689 = vrot.lane.b32.xlu0 %v684_v59, %s1896_s15 }
 0x9dc   :  { %v1804_v6 = vpop.eup %1803 }
 0x9dd   :  { %v701_v9 = vadd.f32 1.0, %v1804_v6 }
 0x9df   :  { %1805 = vrcp.f32 %v701_v9 }
 0x9ec   :  { %v1806_v10 = vpop.eup %1805 }
 0x9f1   :  { %v679_v60 = vpop.f32.mrf.mxu1 }
 0x9f2   :  { %v708_v61 = vadd.f32 %v679_v60, %v2124_v62 }
 0x9f3   :  { %v681_v63 = vpop.f32.mrf.mxu1 }
 0x9f4   :  { %713 = vrot.lane.b32.xlu1 %v708_v61, %s1893_s22 }
 0xa3f   :  { %v712_v11 = vpop.permute.xlu0 %711  ;;  %v688_v13 = vpop.permute.xlu1 %687 }
 0xa40   :  { %v717_v12 = vmul.f32 %v1806_v10, %v712_v11 }
 0xa42   :  { %721 = vrot.lane.b32.xlu0 %v717_v12, %s1893_s22 }
 0xa43   :  { %v690_v15 = vpop.permute.xlu0 %689 }
 0xa44   :  { %v691_v7 = vsel %vm239_vm2, %v688_v13, %v690_v15 }
 0xa45   :  { %v694_v20 = vadd.f32 %v691_v7, %v679_v60 }
 0xa47   :  { %v1706_v28 = vmul.f32 -1.442695, %v694_v20 }
 0xa49   :  { %1807 = vpow2.f32 %v1706_v28 }
 0xa56   :  { %v1808_v30 = vpop.eup %1807 }
 0xa57   :  { %v702_v14 = vadd.f32 1.0, %v1808_v30  ;;  %v162_v30 = vadd.f32 %v2207_v17, %v1941_v8 }
 0xa59   :  { %1809 = vrcp.f32 %v702_v14 }
 0xa66   :  { %v1810_v40 = vpop.eup %1809  ;;  %v714_v42 = vpop.permute.xlu1 %713 }
 0xa67   :  { %v718_v2 = vmul.f32 %v1810_v40, %v714_v42 }
 0xa69   :  { %723 = vrot.lane.b32.xlu1 %v718_v2, %s1893_s22 }
 0xab4   :  { %v722_v44 = vpop.permute.xlu0 %721 }
 0xab5   :  { %v727_v45 = vadd.f32 %v722_v44, %v157_v1 }
 0xab7   :  { %1811 = vtanh.f32 %v727_v45 }
 0xac4   :  { %v1812_v47 = vpop.eup %1811 }
 0xac5   :  { %v731_v48 = vsub.f32 %v2231_v0, %v1812_v47 }
 0xac7   :  { %735 = vrot.lane.b32.xlu0 %v731_v48, %s1894_s23 }
 0xadb   :  { %v724_v49 = vpop.permute.xlu1 %723 }
 0xadc   :  { %v728_v50 = vadd.f32 %v724_v49, %v691_v7 }
 0xade   :  { %1813 = vtanh.f32 %v728_v50 }
 0xaeb   :  { %v1814_v52 = vpop.eup %1813 }
 0xaec   :  { %v732_v53 = vsub.f32 %v2237_v43, %v1814_v52 }
 0xaee   :  { %737 = vrot.lane.b32.xlu1 %v732_v53, %s1894_s23 }
 0xb39   :  { %v736_v41 = vpop.permute.xlu0 %735 }
 0xb3a   :  { %v741_v54 = vmul.f32 %v1806_v10, %v736_v41 }
 0xb3c   :  { %745 = vrot.lane.b32.xlu0 %v741_v54, %s1896_s15 }
 0xb60   :  { %v738_v55 = vpop.permute.xlu1 %737 }
 0xb61   :  { %v742_v58 = vmul.f32 %v1810_v40, %v738_v55 }
 0xb63   :  { %747 = vrot.lane.b32.xlu1 %v742_v58, %s1896_s15 }
 0xbae   :  { %v746_v59 = vpop.permute.xlu0 %745 }
 0xbaf   :  { %v2286_v0 = vadd.f32 %v1812_v47, %v746_v59 }
 0xbb1   :  { %755 = vrot.lane.b32.xlu0 %v2286_v0, %s1893_s22  ;;  %761 = vrot.lane.b32.xlu1 %v2286_v0, %s1894_s23 }
 0xbd5   :  { %v748_v43 = vpop.permute.xlu1 %747 }
 0xbd6   :  { %v2292_v60 = vadd.f32 %v1814_v52, %v748_v43 }
 0xbd8   :  { %763 = vrot.lane.b32.xlu1 %v2292_v60, %s1894_s23  ;;  %757 = vrot.lane.b32.xlu0 %v2292_v60, %s1893_s22 }
 0xc23   :  { %v756_v61 = vpop.permute.xlu0 %755  ;;  %v762_v63 = vpop.permute.xlu1 %761 }
 0xc24   :  { %v767_v1 = vsel %vm239_vm2, %v756_v61, %v762_v63 }
 0xc25   :  { %v769_v3 = vmul.f32 %v767_v1, %v2089_v46 }
 0xc27   :  { %1707 = vmatmul.mubr.msk.f32.vlgmr.msra.gmra.mxu0 %vm244_vm4, %v769_v3 }
 0xc28   :  { %847 = vmatprep.mubr.f32.mxu0 %v1895_v21  ;;  %1134 = vmatpush1.msra.mxu0 %v1961_v23 }
 0xc29   :  { %1135 = vmatprep.subr.mxu0 %v1966_v24 }
 0xc2a   :  { %1136 = vmatpush1.msra.mxu0 %v1972_v25 }
 0xc2b   :  { %1137 = vmatprep.subr.mxu0 %v1979_v26 }
 0xc2c   :  { %1138 = vmatpush1.msra.mxu0 %v1986_v27 }
 0xc2d   :  { %1139 = vmatprep.subr.mxu0 %v1993_v29 }
 0xc2e   :  { %1140 = vmatpush1.msra.mxu0 %v2000_v31 }
 0xc2f   :  { %1141 = vmatprep.subr.mxu0 %v2007_v32 }
 0xc30   :  { %1142 = vmatpush1.msra.mxu0 %v2015_v33 }
 0xc31   :  { %1143 = vmatprep.subr.mxu0 %v2021_v34 }
 0xc32   :  { %1144 = vmatpush1.msra.mxu0 %v2028_v35 }
 0xc33   :  { %1145 = vmatprep.subr.mxu0 %v2035_v36 }
 0xc34   :  { %1146 = vmatpush1.msra.mxu0 %v2048_v37 }
 0xc35   :  { %1147 = vmatprep.subr.mxu0 %v2054_v38 }
 0xc36   :  { %1148 = vmatpush1.msra.mxu0 %v2061_v39 }
 0xc37   :  { %1473 = vmatprep.subr.mxu0 %v1956_v22 }
 0xc4a   :  { %v758_v5 = vpop.permute.xlu0 %757  ;;  %v764_v6 = vpop.permute.xlu1 %763 }
 0xc4b   :  { %v768_v9 = vsel %vm239_vm2, %v758_v5, %v764_v6 }
 0xc4c   :  { %v770_v10 = vmul.f32 %v768_v9, %v2094_v51 }
 0xc4e   :  { %1708 = vmatmul.mubr.msk.f32.gmra.mxu0 %vm244_vm4, %v770_v10 }
 0xc4f   :  { %1181 = vmatprep.mubr.f32.mxu0 %v1895_v21 }
 0xce7   :  { %v843_v11 = vpop.f32.mrf.mxu0 }
 0xce8   :  { %v853_v12 = vadd.f32 %v843_v11, %v2118_v56  ;;  %v877_v13 = vadd.f32 %v843_v11, %v2120_v57  ;;  %v863_v14 = vadd.f32 %v843_v11, %v162_v30 }
 0xce9   :  { %v845_v15 = vpop.f32.mrf.mxu0 }
 0xcea   :  { %881 = vrot.lane.b32.xlu0 %v877_v13, %s1893_s22  ;;  %857 = vrot.lane.b32.xlu1 %v853_v12, %s1896_s15  ;;  %v854_v22 = vadd.f32 %v845_v15, %v2118_v56  ;;  %v1709_v40 = vmul.f32 -1.442695, %v863_v14 }
 0xcec   :  { %1815 = vpow2.f32 %v1709_v40 }
 0xcee   :  { %859 = vrot.lane.b32.xlu0 %v854_v22, %s1896_s15 }
 0xcf9   :  { %v1816_v42 = vpop.eup %1815 }
 0xcfa   :  { %v871_v2 = vadd.f32 1.0, %v1816_v42 }
 0xcfc   :  { %1817 = vrcp.f32 %v871_v2 }
 0xd09   :  { %v1818_v44 = vpop.eup %1817 }
 0xd0e   :  { %v849_v7 = vpop.f32.mrf.mxu0 }
 0xd0f   :  { %v878_v20 = vadd.f32 %v849_v7, %v2124_v62 }
 0xd10   :  { %v851_v28 = vpop.f32.mrf.mxu0 }
 0xd11   :  { %883 = vrot.lane.b32.xlu1 %v878_v20, %s1893_s22 }
 0xd5c   :  { %v882_v45 = vpop.permute.xlu0 %881  ;;  %v858_v48 = vpop.permute.xlu1 %857 }
 0xd5d   :  { %v887_v47 = vmul.f32 %v1818_v44, %v882_v45 }
 0xd5f   :  { %891 = vrot.lane.b32.xlu0 %v887_v47, %s1893_s22 }
 0xd60   :  { %v860_v49 = vpop.permute.xlu0 %859 }
 0xd61   :  { %v861_v50 = vsel %vm239_vm2, %v858_v48, %v860_v49 }
 0xd62   :  { %v864_v52 = vadd.f32 %v861_v50, %v849_v7 }
 0xd64   :  { %v1710_v53 = vmul.f32 -1.442695, %v864_v52 }
 0xd66   :  { %1819 = vpow2.f32 %v1710_v53 }
 0xd73   :  { %v1820_v41 = vpop.eup %1819 }
 0xd74   :  { %v872_v17 = vadd.f32 1.0, %v1820_v41 }
 0xd76   :  { %1821 = vrcp.f32 %v872_v17 }
 0xd83   :  { %v1822_v54 = vpop.eup %1821  ;;  %v884_v55 = vpop.permute.xlu1 %883 }
 0xd84   :  { %v888_v58 = vmul.f32 %v1822_v54, %v884_v55 }
 0xd86   :  { %893 = vrot.lane.b32.xlu1 %v888_v58, %s1893_s22 }
 0xdd1   :  { %v892_v59 = vpop.permute.xlu0 %891 }
 0xdd2   :  { %v897_v43 = vadd.f32 %v892_v59, %v162_v30 }
 0xdd4   :  { %1823 = vtanh.f32 %v897_v43 }
 0xde1   :  { %v1824_v61 = vpop.eup %1823 }
 0xde2   :  { %v901_v63 = vsub.f32 %v2286_v0, %v1824_v61 }
 0xde4   :  { %905 = vrot.lane.b32.xlu0 %v901_v63, %s1894_s23 }
 0xdf8   :  { %v894_v1 = vpop.permute.xlu1 %893 }
 0xdf9   :  { %v898_v3 = vadd.f32 %v894_v1, %v861_v50 }
 0xdfb   :  { %1825 = vtanh.f32 %v898_v3 }
 0xe08   :  { %v1826_v5 = vpop.eup %1825 }
 0xe09   :  { %v902_v6 = vsub.f32 %v2292_v60, %v1826_v5 }
 0xe0b   :  { %907 = vrot.lane.b32.xlu1 %v902_v6, %s1894_s23 }
 0xe56   :  { %v906_v9 = vpop.permute.xlu0 %905 }
 0xe57   :  { %v911_v10 = vmul.f32 %v1818_v44, %v906_v9 }
 0xe59   :  { %915 = vrot.lane.b32.xlu0 %v911_v10, %s1896_s15 }
 0xe7d   :  { %v908_v11 = vpop.permute.xlu1 %907 }
 0xe7e   :  { %v912_v12 = vmul.f32 %v1822_v54, %v908_v11 }
 0xe80   :  { %917 = vrot.lane.b32.xlu1 %v912_v12, %s1896_s15 }
 0xecb   :  { %v916_v13 = vpop.permute.xlu0 %915 }
 0xecc   :  { %v2341_v0 = vadd.f32 %v1824_v61, %v916_v13 }
 0xece   :  { %925 = vrot.lane.b32.xlu0 %v2341_v0, %s1893_s22  ;;  %931 = vrot.lane.b32.xlu1 %v2341_v0, %s1894_s23 }
 0xef2   :  { %v918_v60 = vpop.permute.xlu1 %917 }
 0xef3   :  { %v2347_v15 = vadd.f32 %v1826_v5, %v918_v60 }
 0xef5   :  { %933 = vrot.lane.b32.xlu1 %v2347_v15, %s1894_s23  ;;  %927 = vrot.lane.b32.xlu0 %v2347_v15, %s1893_s22 }
 0xf40   :  { %v926_v22 = vpop.permute.xlu0 %925  ;;  %v932_v7 = vpop.permute.xlu1 %931 }
 0xf41   :  { %v937_v20 = vsel %vm239_vm2, %v926_v22, %v932_v7  ;;  %v1877_v22 = vld [vmem:[%s2555_s1 + $0x80] sm:$0xff]  ;;  %v1878_v7 = vld [vmem:[%s2555_s1 + $0x78] sm:$0xff] }
 0xf42   :  { %v939_v28 = vmul.f32 %v937_v20, %v2089_v46  ;;  %v1879_v20 = vld [vmem:[%s2555_s1 + $0x70] sm:$0xff] }
 0xf44   :  { %1711 = vmatmul.mubr.msk.f32.vlgmr.msra.gmra.mxu1 %vm244_vm4, %v939_v28  ;;  %v1880_v28 = vld [vmem:[%s2555_s1 + $0x68] sm:$0xff] }
 0xf45   :  { %1017 = vmatprep.mubr.f32.mxu1 %v1895_v21  ;;  %1304 = vmatpush1.msra.mxu1 %v1961_v23 }
 0xf46   :  { %1305 = vmatprep.subr.mxu1 %v1966_v24 }
 0xf47   :  { %1306 = vmatpush1.msra.mxu1 %v1972_v25 }
 0xf48   :  { %1307 = vmatprep.subr.mxu1 %v1979_v26 }
 0xf49   :  { %1308 = vmatpush1.msra.mxu1 %v1986_v27 }
 0xf4a   :  { %1309 = vmatprep.subr.mxu1 %v1993_v29 }
 0xf4b   :  { %1310 = vmatpush1.msra.mxu1 %v2000_v31 }
 0xf4c   :  { %1311 = vmatprep.subr.mxu1 %v2007_v32 }
 0xf4d   :  { %1312 = vmatpush1.msra.mxu1 %v2015_v33 }
 0xf4e   :  { %1313 = vmatprep.subr.mxu1 %v2021_v34 }
 0xf4f   :  { %1314 = vmatpush1.msra.mxu1 %v2028_v35 }
 0xf50   :  { %1315 = vmatprep.subr.mxu1 %v2035_v36 }
 0xf51   :  { %1316 = vmatpush1.msra.mxu1 %v2048_v37  ;;  %v167_v37 = vadd.f32 %v2205_v16, %v1941_v8 }
 0xf52   :  { %1317 = vmatprep.subr.mxu1 %v2054_v38 }
 0xf53   :  { %1318 = vmatpush1.msra.mxu1 %v2061_v39 }
 0xf54   :  { %1757 = vmatprep.subr.mxu1 %v1895_v21 }
 0xf67   :  { %v928_v23 = vpop.permute.xlu0 %927  ;;  %v934_v24 = vpop.permute.xlu1 %933 }
 0xf68   :  { %v938_v25 = vsel %vm239_vm2, %v928_v23, %v934_v24  ;;  %v1881_v23 = vld [vmem:[%s2555_s1 + $0x60] sm:$0xff]  ;;  %v1882_v24 = vld [vmem:[%s2555_s1 + $0x58] sm:$0xff] }
 0xf69   :  { %v940_v26 = vmul.f32 %v938_v25, %v2094_v51  ;;  %v1883_v25 = vld [vmem:[%s2555_s1 + $0x50] sm:$0xff] }
 0xf6b   :  { %1712 = vmatmul.mubr.msk.f32.gmra.mxu1 %vm244_vm4, %v940_v26  ;;  %v1884_v26 = vld [vmem:[%s2555_s1 + $0x48] sm:$0xff] }
 0xf6c   :  { %1351 = vmatprep.mubr.f32.mxu1 %v1895_v21 }
0x1004   :  { %v1013_v27 = vpop.f32.mrf.mxu1 }
0x1005   :  { %v1023_v29 = vadd.f32 %v1013_v27, %v2118_v56  ;;  %v1047_v31 = vadd.f32 %v1013_v27, %v2120_v57  ;;  %v1033_v38 = vadd.f32 %v1013_v27, %v167_v37  ;;  %v1885_v27 = vld [vmem:[%s2555_s1 + $0x40] sm:$0xff] }
0x1006   :  { %v1015_v32 = vpop.f32.mrf.mxu1 }
0x1007   :  { %1051 = vrot.lane.b32.xlu0 %v1047_v31, %s1893_s22  ;;  %1027 = vrot.lane.b32.xlu1 %v1023_v29, %s1896_s15  ;;  %v1024_v33 = vadd.f32 %v1015_v32, %v2118_v56  ;;  %v1713_v39 = vmul.f32 -1.442695, %v1033_v38  ;;  %v1886_v29 = vld [vmem:[%s2555_s1 + $0x38] sm:$0xff]  ;;  %v1887_v31 = vld [vmem:[%s2555_s1 + $0x30] sm:$0xff] }
0x1008   :  { %v1888_v32 = vld [vmem:[%s2555_s1 + $0x28] sm:$0xff] }
0x1009   :  { %1827 = vpow2.f32 %v1713_v39 }
0x100b   :  { %1029 = vrot.lane.b32.xlu0 %v1024_v33, %s1896_s15  ;;  %v1889_v33 = vld [vmem:[%s2555_s1 + $0x20] sm:$0xff] }
0x1016   :  { %v1828_v30 = vpop.eup %1827 }
0x1017   :  { %v1041_v14 = vadd.f32 1.0, %v1828_v30 }
0x1019   :  { %1829 = vrcp.f32 %v1041_v14 }
0x1026   :  { %v1830_v40 = vpop.eup %1829 }
0x102b   :  { %v1019_v34 = vpop.f32.mrf.mxu1 }
0x102c   :  { %v1048_v35 = vadd.f32 %v1019_v34, %v2124_v62 }
0x102d   :  { %v1021_v36 = vpop.f32.mrf.mxu1 }
0x102e   :  { %1053 = vrot.lane.b32.xlu1 %v1048_v35, %s1893_s22  ;;  %v1891_v35 = vld [vmem:[%s2555_s1 + $0x10] sm:$0xff] }
0x1079   :  { %v1052_v42 = vpop.permute.xlu0 %1051  ;;  %v1028_v44 = vpop.permute.xlu1 %1027 }
0x107a   :  { %v1057_v2 = vmul.f32 %v1830_v40, %v1052_v42 }
0x107c   :  { %1061 = vrot.lane.b32.xlu0 %v1057_v2, %s1893_s22 }
0x107d   :  { %v1030_v45 = vpop.permute.xlu0 %1029 }
0x107e   :  { %v1031_v47 = vsel %vm239_vm2, %v1028_v44, %v1030_v45 }
0x107f   :  { %v1034_v48 = vadd.f32 %v1031_v47, %v1019_v34  ;;  %v1890_v34 = vld [vmem:[%s2555_s1 + $0x18] sm:$0xff] }
0x1081   :  { %v1714_v49 = vmul.f32 -1.442695, %v1034_v48  ;;  %v172_v48 = vadd.f32 %v2211_v19, %v1941_v8 }
0x1083   :  { %1831 = vpow2.f32 %v1714_v49 }
0x1090   :  { %v1832_v50 = vpop.eup %1831 }
0x1091   :  { %v1042_v16 = vadd.f32 1.0, %v1832_v50 }
0x1093   :  { %1833 = vrcp.f32 %v1042_v16 }
0x10a0   :  { %v1834_v52 = vpop.eup %1833  ;;  %v1054_v53 = vpop.permute.xlu1 %1053 }
0x10a1   :  { %v1058_v41 = vmul.f32 %v1834_v52, %v1054_v53 }
0x10a3   :  { %1063 = vrot.lane.b32.xlu1 %v1058_v41, %s1893_s22 }
0x10ee   :  { %v1062_v17 = vpop.permute.xlu0 %1061 }
0x10ef   :  { %v1067_v54 = vadd.f32 %v1062_v17, %v167_v37 }
0x10f1   :  { %1835 = vtanh.f32 %v1067_v54 }
0x10fe   :  { %v1836_v55 = vpop.eup %1835 }
0x10ff   :  { %v1071_v58 = vsub.f32 %v2341_v0, %v1836_v55 }
0x1101   :  { %1075 = vrot.lane.b32.xlu0 %v1071_v58, %s1894_s23 }
0x1115   :  { %v1064_v59 = vpop.permute.xlu1 %1063 }
0x1116   :  { %v1068_v43 = vadd.f32 %v1064_v59, %v1031_v47 }
0x1118   :  { %1837 = vtanh.f32 %v1068_v43 }
0x1125   :  { %v1838_v61 = vpop.eup %1837 }
0x1126   :  { %v1072_v63 = vsub.f32 %v2347_v15, %v1838_v61 }
0x1128   :  { %1077 = vrot.lane.b32.xlu1 %v1072_v63, %s1894_s23 }
0x1173   :  { %v1076_v1 = vpop.permute.xlu0 %1075 }
0x1174   :  { %v1081_v3 = vmul.f32 %v1830_v40, %v1076_v1 }
0x1176   :  { %1085 = vrot.lane.b32.xlu0 %v1081_v3, %s1896_s15 }
0x119a   :  { %v1078_v5 = vpop.permute.xlu1 %1077 }
0x119b   :  { %v1082_v6 = vmul.f32 %v1834_v52, %v1078_v5 }
0x119d   :  { %1087 = vrot.lane.b32.xlu1 %v1082_v6, %s1896_s15 }
0x11e8   :  { %v1086_v9 = vpop.permute.xlu0 %1085 }
0x11e9   :  { %v2396_v10 = vadd.f32 %v1836_v55, %v1086_v9 }
0x11eb   :  { %1095 = vrot.lane.b32.xlu0 %v2396_v10, %s1893_s22  ;;  %1101 = vrot.lane.b32.xlu1 %v2396_v10, %s1894_s23 }
0x120f   :  { %v1088_v11 = vpop.permute.xlu1 %1087 }
0x1210   :  { %v2402_v12 = vadd.f32 %v1838_v61, %v1088_v11 }
0x1212   :  { %1103 = vrot.lane.b32.xlu1 %v2402_v12, %s1894_s23  ;;  %1097 = vrot.lane.b32.xlu0 %v2402_v12, %s1893_s22 }
0x125d   :  { %v1096_v13 = vpop.permute.xlu0 %1095  ;;  %v1102_v0 = vpop.permute.xlu1 %1101 }
0x125e   :  { %v1107_v60 = vsel %vm239_vm2, %v1096_v13, %v1102_v0 }
0x125f   :  { %v1109_v15 = vmul.f32 %v1107_v60, %v2089_v46 }
0x1261   :  { %1715 = vmatmul.mubr.msk.f32.vlgmr.msra.gmra.mxu0 %vm244_vm4, %v1109_v15 }
0x1262   :  { %1187 = vmatprep.mubr.f32.mxu0 %v1895_v21  ;;  %1474 = vmatpush1.msra.mxu0 %v1877_v22 }
0x1263   :  { %1475 = vmatprep.subr.mxu0 %v1878_v7 }
0x1264   :  { %1476 = vmatpush1.msra.mxu0 %v1879_v20 }
0x1265   :  { %1477 = vmatprep.subr.mxu0 %v1880_v28 }
0x1266   :  { %1478 = vmatpush1.msra.mxu0 %v1881_v23 }
0x1267   :  { %1479 = vmatprep.subr.mxu0 %v1882_v24 }
0x1268   :  { %1480 = vmatpush1.msra.mxu0 %v1883_v25 }
0x1269   :  { %1481 = vmatprep.subr.mxu0 %v1884_v26 }
0x126a   :  { %1482 = vmatpush1.msra.mxu0 %v1885_v27 }
0x126b   :  { %1483 = vmatprep.subr.mxu0 %v1886_v29 }
0x126c   :  { %1484 = vmatpush1.msra.mxu0 %v1887_v31 }
0x126d   :  { %1485 = vmatprep.subr.mxu0 %v1888_v32 }
0x126e   :  { %1486 = vmatpush1.msra.mxu0 %v1889_v33 }
0x126f   :  { %1487 = vmatprep.subr.mxu0 %v1890_v34 }
0x1270   :  { %1488 = vmatpush1.msra.mxu0 %v1891_v35 }
0x1284   :  { %v1098_v36 = vpop.permute.xlu0 %1097  ;;  %v1104_v37 = vpop.permute.xlu1 %1103 }
0x1285   :  { %v1108_v38 = vsel %vm239_vm2, %v1098_v36, %v1104_v37 }
0x1286   :  { %v1110_v39 = vmul.f32 %v1108_v38, %v2094_v51 }
0x1288   :  { %1716 = vmatmul.mubr.msk.f32.gmra.mxu0 %vm244_vm4, %v1110_v39 }
0x1289   :  { %1521 = vmatprep.mubr.f32.mxu0 %v1895_v21 }
0x1321   :  { %v1183_v30 = vpop.f32.mrf.mxu0 }
0x1322   :  { %v1193_v14 = vadd.f32 %v1183_v30, %v2118_v56  ;;  %v1217_v40 = vadd.f32 %v1183_v30, %v2120_v57  ;;  %v1203_v49 = vadd.f32 %v1183_v30, %v172_v48 }
0x1323   :  { %v1185_v42 = vpop.f32.mrf.mxu0 }
0x1324   :  { %1221 = vrot.lane.b32.xlu0 %v1217_v40, %s1893_s22  ;;  %1197 = vrot.lane.b32.xlu1 %v1193_v14, %s1896_s15  ;;  %v1194_v2 = vadd.f32 %v1185_v42, %v2118_v56  ;;  %v1717_v50 = vmul.f32 -1.442695, %v1203_v49  ;;  %v177_v42 = vadd.f32 %v2209_v18, %v1941_v8 }
0x1326   :  { %1839 = vpow2.f32 %v1717_v50 }
0x1328   :  { %1199 = vrot.lane.b32.xlu0 %v1194_v2, %s1896_s15 }
0x1333   :  { %v1840_v16 = vpop.eup %1839 }
0x1334   :  { %v1211_v52 = vadd.f32 1.0, %v1840_v16 }
0x1336   :  { %1841 = vrcp.f32 %v1211_v52 }
0x1343   :  { %v1842_v53 = vpop.eup %1841 }
0x1348   :  { %v1189_v44 = vpop.f32.mrf.mxu0 }
0x1349   :  { %v1218_v45 = vadd.f32 %v1189_v44, %v2124_v62 }
0x134a   :  { %v1191_v47 = vpop.f32.mrf.mxu0 }
0x134b   :  { %1223 = vrot.lane.b32.xlu1 %v1218_v45, %s1893_s22 }
0x1396   :  { %v1222_v41 = vpop.permute.xlu0 %1221  ;;  %v1198_v54 = vpop.permute.xlu1 %1197 }
0x1397   :  { %v1227_v17 = vmul.f32 %v1842_v53, %v1222_v41 }
0x1399   :  { %1231 = vrot.lane.b32.xlu0 %v1227_v17, %s1893_s22 }
0x139a   :  { %v1200_v55 = vpop.permute.xlu0 %1199 }
0x139b   :  { %v1201_v58 = vsel %vm239_vm2, %v1198_v54, %v1200_v55 }
0x139c   :  { %v1204_v59 = vadd.f32 %v1201_v58, %v1189_v44 }
0x139e   :  { %v1718_v43 = vmul.f32 -1.442695, %v1204_v59 }
0x13a0   :  { %1843 = vpow2.f32 %v1718_v43 }
0x13ad   :  { %v1844_v61 = vpop.eup %1843 }
0x13ae   :  { %v1212_v19 = vadd.f32 1.0, %v1844_v61 }
0x13b0   :  { %1845 = vrcp.f32 %v1212_v19 }
0x13bd   :  { %v1846_v63 = vpop.eup %1845  ;;  %v1224_v1 = vpop.permute.xlu1 %1223 }
0x13be   :  { %v1228_v3 = vmul.f32 %v1846_v63, %v1224_v1 }
0x13c0   :  { %1233 = vrot.lane.b32.xlu1 %v1228_v3, %s1893_s22 }
0x140b   :  { %v1232_v5 = vpop.permute.xlu0 %1231 }
0x140c   :  { %v1237_v6 = vadd.f32 %v1232_v5, %v172_v48 }
0x140e   :  { %1847 = vtanh.f32 %v1237_v6 }
0x141b   :  { %v1848_v9 = vpop.eup %1847 }
0x141c   :  { %v1241_v11 = vsub.f32 %v2396_v10, %v1848_v9 }
0x141e   :  { %1245 = vrot.lane.b32.xlu0 %v1241_v11, %s1894_s23 }
0x1432   :  { %v1234_v13 = vpop.permute.xlu1 %1233 }
0x1433   :  { %v1238_v0 = vadd.f32 %v1234_v13, %v1201_v58 }
0x1435   :  { %1849 = vtanh.f32 %v1238_v0 }
0x1442   :  { %v1850_v60 = vpop.eup %1849 }
0x1443   :  { %v1242_v15 = vsub.f32 %v2402_v12, %v1850_v60 }
0x1445   :  { %1247 = vrot.lane.b32.xlu1 %v1242_v15, %s1894_s23 }
0x1490   :  { %v1246_v22 = vpop.permute.xlu0 %1245 }
0x1491   :  { %v1251_v7 = vmul.f32 %v1842_v53, %v1246_v22 }
0x1493   :  { %1255 = vrot.lane.b32.xlu0 %v1251_v7, %s1896_s15 }
0x14b7   :  { %v1248_v20 = vpop.permute.xlu1 %1247 }
0x14b8   :  { %v1252_v28 = vmul.f32 %v1846_v63, %v1248_v20 }
0x14ba   :  { %1257 = vrot.lane.b32.xlu1 %v1252_v28, %s1896_s15 }
0x1505   :  { %v1256_v23 = vpop.permute.xlu0 %1255 }
0x1506   :  { %v1261_v10 = vadd.f32 %v1848_v9, %v1256_v23 }
0x1508   :  { %1265 = vrot.lane.b32.xlu0 %v1261_v10, %s1893_s22  ;;  %1271 = vrot.lane.b32.xlu1 %v1261_v10, %s1894_s23 }
0x152c   :  { %v1258_v24 = vpop.permute.xlu1 %1257 }
0x152d   :  { %v1262_v25 = vadd.f32 %v1850_v60, %v1258_v24 }
0x152f   :  { %1273 = vrot.lane.b32.xlu1 %v1262_v25, %s1894_s23  ;;  %1267 = vrot.lane.b32.xlu0 %v1262_v25, %s1893_s22 }
0x157a   :  { %v1266_v12 = vpop.permute.xlu0 %1265  ;;  %v1272_v26 = vpop.permute.xlu1 %1271 }
0x157b   :  { %v1277_v27 = vsel %vm239_vm2, %v1266_v12, %v1272_v26 }
0x157c   :  { %v1279_v29 = vmul.f32 %v1277_v27, %v2089_v46 }
0x157e   :  { %1719 = vmatmul.mubr.msk.f32.vlgmr.msra.gmra.mxu1 %vm244_vm4, %v1279_v29 }
0x157f   :  { %1357 = vmatprep.mubr.f32.mxu1 %v1895_v21 }
0x15a1   :  { %v1268_v31 = vpop.permute.xlu0 %1267  ;;  %v1274_v32 = vpop.permute.xlu1 %1273 }
0x15a2   :  { %v1278_v33 = vsel %vm239_vm2, %v1268_v31, %v1274_v32 }
0x15a3   :  { %v1280_v34 = vmul.f32 %v1278_v33, %v2094_v51 }
0x15a5   :  { %1720 = vmatmul.mubr.msk.f32.gmra.mxu1 %vm244_vm4, %v1280_v34 }
0x15a6   :  { %1765 = vmatprep.mubr.msk.f32.mxu1 %vm1897_vm5, %v1895_v21 }
0x163e   :  { %v1353_v35 = vpop.f32.mrf.mxu1 }
0x163f   :  { %v1363_v36 = vadd.f32 %v1353_v35, %v2118_v56  ;;  %v1387_v39 = vadd.f32 %v1353_v35, %v2120_v57  ;;  %v1373_v2 = vadd.f32 %v1353_v35, %v177_v42 }
0x1640   :  { %v1355_v37 = vpop.f32.mrf.mxu1 }
0x1641   :  { %v1364_v38 = vadd.f32 %v1355_v37, %v2118_v56  ;;  %1367 = vrot.lane.b32.xlu0 %v1363_v36, %s1896_s15  ;;  %v1721_v44 = vmul.f32 -1.442695, %v1373_v2 }
0x1643   :  { %1369 = vrot.lane.b32.xlu1 %v1364_v38, %s1896_s15  ;;  %1851 = vpow2.f32 %v1721_v44 }
0x1645   :  { %1391 = vrot.lane.b32.xlu0 %v1387_v39, %s1893_s22 }
0x1650   :  { %v1852_v45 = vpop.eup %1851 }
0x1651   :  { %v1381_v47 = vadd.f32 1.0, %v1852_v45 }
0x1653   :  { %1853 = vrcp.f32 %v1381_v47 }
0x1660   :  { %v1854_v50 = vpop.eup %1853 }
0x1665   :  { %v1359_v30 = vpop.f32.mrf.mxu1 }
0x1666   :  { %v1388_v14 = vadd.f32 %v1359_v30, %v2124_v62 }
0x1667   :  { %v1361_v40 = vpop.f32.mrf.mxu1 }
0x1668   :  { %1393 = vrot.lane.b32.xlu1 %v1388_v14, %s1893_s22 }
0x16b3   :  { %v1368_v57 = vpop.permute.xlu0 %1367 }
0x16b5   :  { %v1370_v48 = vpop.permute.xlu1 %1369 }
0x16b6   :  { %v1371_v49 = vsel %vm239_vm2, %v1368_v57, %v1370_v48  ;;  %v33_v57 = vld [vmem:[%s2555_s1 + $0xb0] sm:$0xff]  ;;  %v32_v48 = vld [vmem:[%s2555_s1 + $0xa0] sm:$0xff] }
0x16b7   :  { %v1374_v16 = vadd.f32 %v1371_v49, %v1359_v30  ;;  %v1392_v52 = vpop.permute.xlu0 %1391 }
0x16b8   :  { %v1397_v53 = vmul.f32 %v1854_v50, %v1392_v52 }
0x16b9   :  { %v1722_v41 = vmul.f32 -1.442695, %v1374_v16 }
0x16ba   :  { %1401 = vrot.lane.b32.xlu0 %v1397_v53, %s1893_s22 }
0x16bb   :  { %1855 = vpow2.f32 %v1722_v41 }
0x16c8   :  { %v1856_v17 = vpop.eup %1855 }
0x16c9   :  { %v1382_v8 = vadd.f32 1.0, %v1856_v17 }
0x16cb   :  { %1857 = vrcp.f32 %v1382_v8  ;;  %v1582_v8 = vsub.s32 2, %v1930_v4 }
0x16d8   :  { %v1858_v18 = vpop.eup %1857 }
0x16da   :  { %v1394_v54 = vpop.permute.xlu1 %1393 }
0x16db   :  { %v1398_v55 = vmul.f32 %v1858_v18, %v1394_v54  ;;  %v1662_v54 = vsub.s32 3, %v1930_v4 }
0x16dd   :  { %1403 = vrot.lane.b32.xlu1 %v1398_v55, %s1893_s22 }
0x172c   :  { %v1402_v58 = vpop.permute.xlu0 %1401 }
0x172d   :  { %v1407_v59 = vadd.f32 %v1402_v58, %v177_v42 }
0x172f   :  { %1859 = vtanh.f32 %v1407_v59 }
0x173c   :  { %v1860_v43 = vpop.eup %1859 }
0x173d   :  { %v1411_v61 = vsub.f32 %v1261_v10, %v1860_v43 }
0x173f   :  { %1415 = vrot.lane.b32.xlu0 %v1411_v61, %s1894_s23 }
0x174f   :  { %v1404_v19 = vpop.permute.xlu1 %1403 }
0x1750   :  { %v1408_v63 = vadd.f32 %v1404_v19, %v1371_v49  ;;  %v31_v49 = vld [vmem:[%s2555_s1 + $0x90] sm:$0xff] }
0x1752   :  { %1861 = vtanh.f32 %v1408_v63 }
0x175f   :  { %v1862_v1 = vpop.eup %1861 }
0x1760   :  { %v1412_v3 = vsub.f32 %v1262_v25, %v1862_v1 }
0x1762   :  { %1417 = vrot.lane.b32.xlu1 %v1412_v3, %s1894_s23 }
0x17b1   :  { %v1416_v5 = vpop.permute.xlu0 %1415 }
0x17b2   :  { %v1421_v6 = vmul.f32 %v1854_v50, %v1416_v5 }
0x17b4   :  { %1425 = vrot.lane.b32.xlu0 %v1421_v6, %s1896_s15 }
0x17d4   :  { %v1418_v9 = vpop.permute.xlu1 %1417 }
0x17d5   :  { %v1422_v11 = vmul.f32 %v1858_v18, %v1418_v9  ;;  %v1892_v18 = vld [vmem:[%s2557_s2 + $0x10] sm:$0xff] }
0x17d6   :  { %v1663_v59 = vrot.slane %v1892_v18, %v1662_v54 }
0x17d7   :  { %1427 = vrot.lane.b32.xlu1 %v1422_v11, %s1896_s15 }
0x1826   :  { %v1426_v13 = vpop.permute.xlu0 %1425 }
0x1827   :  { %v1431_v0 = vadd.f32 %v1860_v43, %v1426_v13 }
0x1829   :  { %1435 = vrot.lane.b32.xlu0 %v1431_v0, %s1893_s22  ;;  %1441 = vrot.lane.b32.xlu1 %v1431_v0, %s1894_s23 }
0x1849   :  { %v1428_v60 = vpop.permute.xlu1 %1427 }
0x184a   :  { %v1432_v15 = vadd.f32 %v1862_v1, %v1428_v60  ;;  %v1671_v1 = vsub.s32 4, %v1930_v4 }
0x184c   :  { %1443 = vrot.lane.b32.xlu1 %v1432_v15, %s1894_s23  ;;  %1437 = vrot.lane.b32.xlu0 %v1432_v15, %s1893_s22  ;;  %v1672_v3 = vrot.slane %v1892_v18, %v1671_v1 }
0x189b   :  { %v1436_v22 = vpop.permute.xlu0 %1435  ;;  %v1442_v7 = vpop.permute.xlu1 %1441 }
0x189c   :  { %v1447_v20 = vsel %vm239_vm2, %v1436_v22, %v1442_v7 }
0x189d   :  { %v1449_v28 = vmul.f32 %v1447_v20, %v2089_v46 }
0x189f   :  { %1723 = vmatmul.mubr.msk.f32.vlgmr.msra.gmra.mxu0 %vm244_vm4, %v1449_v28 }
0x18a0   :  { %1527 = vmatprep.mubr.f32.mxu0 %v1895_v21 }
0x18be   :  { %v1438_v23 = vpop.permute.xlu0 %1437  ;;  %v1444_v10 = vpop.permute.xlu1 %1443 }
0x18bf   :  { %v1448_v24 = vsel %vm239_vm2, %v1438_v23, %v1444_v10 }
0x18c0   :  { %v1450_v25 = vmul.f32 %v1448_v24, %v2094_v51 }
0x18c2   :  { %1724 = vmatmul.mubr.msk.f32.gmra.mxu0 %vm244_vm4, %v1450_v25 }
0x195f   :  { %v1523_v12 = vpop.f32.mrf.mxu0 }
0x1960   :  { %v1533_v31 = vadd.f32 %v1523_v12, %v2118_v56 }
0x1961   :  { %v1525_v26 = vpop.f32.mrf.mxu0 }
0x1982   :  { %v1529_v27 = vpop.f32.mrf.mxu0 }
0x1983   :  { %v1553_v29 = vadd.f32 %v1529_v27, %v2124_v62  ;;  %1536 = vrot.lane.b32.xlu0 %v1529_v27, %s1894_s23  ;;  %v1534_v62 = vadd.f32 %v1525_v26, %v2118_v56  ;;  %v34_v56 = vld [vmem:[%s2555_s1 + $0xc0] sm:$0xff] }
0x1984   :  { %v1531_v46 = vpop.f32.mrf.mxu0  ;;  %1758 = vmatpush3.msra.mxu1 %v34_v56 }
0x1985   :  { %1555 = vrot.lane.b32.xlu1 %v1553_v29, %s1896_s15  ;;  %1759 = vmatprep.subr.mxu1 %v1895_v21 }
0x1986   :  { %1760 = vmatpush3.msra.mxu1 %v33_v57 }
0x1987   :  { %1761 = vmatprep.subr.mxu1 %v1895_v21 }
0x1988   :  { %1762 = vmatpush3.msra.mxu1 %v32_v48 }
0x1989   :  { %1763 = vmatprep.subr.mxu1 %v1895_v21  ;;  %v1583_v21 = vrot.slane %v1892_v18, %v1582_v8 }
0x198a   :  { %1764 = vmatpush3.msra.mxu1 %v31_v49 }
0x19f5   :  { %v1537_v32 = vpop.permute.xlu0 %1536 }
0x19f6   :  { %v1539_v33 = vadd.f32 %v1537_v32, %v1533_v31  ;;  %v1540_v2 = vadd.f32 %v1537_v32, %v1534_v62 }
0x19f7   :  { %v1556_v37 = vpop.permute.xlu1 %1555 }
0x19f8   :  { %v1725_v34 = vmul.f32 -1.442695, %v1539_v33  ;;  %v1726_v44 = vmul.f32 -1.442695, %v1540_v2 }
0x19fa   :  { %1863 = vpow2.f32 %v1725_v34 }
0x1a07   :  { %v1864_v35 = vpop.eup %1863 }
0x1a08   :  { %v1547_v51 = vadd.f32 1.0, %v1864_v35 }
0x1a0a   :  { %1865 = vrcp.f32 %v1547_v51 }
0x1a17   :  { %v1866_v36 = vpop.eup %1865 }
0x1a18   :  { %v1558_v38 = vmul.f32 %v1866_v36, %v1556_v37 }
0x1a1a   :  { %1560 = vrot.lane.b32.xlu0 %v1558_v38, %s1893_s22 }
0x1a8c   :  { %v1561_v39 = vpop.permute.xlu0 %1560 }
0x1a8d   :  { %v1563_v30 = vadd.f32 %v1561_v39, %v1534_v62 }
0x1a8f   :  { %1867 = vtanh.f32 %v1563_v30 }
0x1a90   :  { %1869 = vpow2.f32 %v1726_v44 }
0x1a9c   :  { %v1868_v14 = vpop.eup %1867 }
0x1a9d   :  { %1566 = vrot.lane.b32.xlu1 %v1868_v14, %s1896_s15  ;;  %v1870_v45 = vpop.eup %1869 }
0x1a9e   :  { %v1548_v47 = vadd.f32 1.0, %v1870_v45 }
0x1aa0   :  { %1871 = vrcp.f32 %v1548_v47 }
0x1aad   :  { %v1872_v50 = vpop.eup %1871 }
0x1b0f   :  { %v1567_v40 = vpop.permute.xlu1 %1566 }
0x1b10   :  { %v1569_v42 = vsub.f32 %v1432_v15, %v1567_v40 }
0x1b12   :  { %1571 = vrot.lane.b32.xlu0 %v1569_v42, %s1893_s22 }
0x1b84   :  { %v1572_v16 = vpop.permute.xlu0 %1571 }
0x1b85   :  { %v1574_v52 = vmul.f32 %v1872_v50, %v1572_v16 }
0x1b87   :  { %1576 = vrot.lane.b32.xlu1 %v1574_v52, %s1896_s15 }
0x1bf9   :  { %v1577_v53 = vpop.permute.xlu1 %1576 }
0x1bfa   :  { %v1579_v41 = vadd.f32 %v1868_v14, %v1577_v53 }
0x1bfc   :  { %1585 = vrot.lane.b32.xlu0 %v1579_v41, %s1894_s23 }
0x1c6e   :  { %v1586_v17 = vpop.permute.xlu0 %1585 }
0x1c6f   :  { %1766 = vmatmul.mubr.msk.f32.vlgmr.msra.gmra.mxu1 %vm239_vm2, %v1586_v17 }
0x1d2f   :  { %v1655_v55 = vpop.f32.mrf.mxu1 }
0x1d30   :  { %v1656_v58 = vadd.f32 %v1655_v55, %v1583_v21 }
0x1d31   :  { %v1767_v43 = vpop.f32.mrf.mxu1 }
0x1d32   :  { %v1659_v61 = vmax.f32 %v1656_v58, 0.0 }
0x1d34   :  { %v1664_v19 = vmul.f32 %v1663_v59, %v1659_v61 }
0x1d36   :  { %v1666_v63 = vsel %vm1665_vm6, %v1664_v19, 0.0 }
0x1d37   :  { %1667 = vadd.xlane.f32.xlu1 %v1666_v63 }
0x1dc0   :  { %v1668_v5 = vpop.xlane.xlu1 %1667 }
0x1dc1   :  { %v1673_v6 = vadd.f32 %v1672_v3, %v1668_v5 }
0x1dc3   :  { %v1728_v9 = vmul.f32 -1.442695, %v1673_v6 }
0x1dc5   :  { %1873 = vpow2.f32 %v1728_v9 }
0x1dd2   :  { %v1874_v11 = vpop.eup %1873 }
0x1dd3   :  { %v1677_v13 = vadd.f32 1.0, %v1874_v11 }
0x1dd5   :  { %1875 = vrcp.f32 %v1677_v13 }
0x1de2   :  { %v1876_v0 = vpop.eup %1875 }
0x1de3   :  { %1681 = vst.msk [vmem:[%s2558_s3] sm:$0x3] %vm1680_vm7, %v1876_v0 }

</bundles_post_ra>
